<compile_context>
chip_gen: v6e
topology: v6e:2x2x1
jax: 0.10.0
libtpu: 0.0.40
codegen_flags: <defaults>
</compile_context>

<pallas_src>
import math

import jax
import jax.numpy as jnp
from jax.experimental import pallas as pl
from jax.experimental.pallas import tpu as pltpu


def _layernorm(x, g, b, eps=1e-5):
    mu = jnp.mean(x, axis=-1, keepdims=True)
    xc = x - mu
    var = jnp.mean(xc * xc, axis=-1, keepdims=True)
    return xc * jax.lax.rsqrt(var + eps) * g + b


def _erf_kernel(x):
    # Abramowitz & Stegun 7.1.26 (|err| < 1.5e-7) -> plain VPU/EUP ops.
    p = 0.3275911
    a1, a2, a3, a4, a5 = (0.254829592, -0.284496736, 1.421413741,
                          -1.453152027, 1.061405429)
    sgn = jnp.where(x >= 0.0, 1.0, -1.0)
    ax = jnp.abs(x)
    t = pl.reciprocal(1.0 + p * ax, approx=True)        # EUP slot
    poly = ((((a5 * t + a4) * t + a3) * t + a2) * t + a1) * t
    return sgn * (1.0 - poly * jnp.exp(-ax * ax))


def _gelu_exact_kernel(x):
    # torch nn.GELU() default: 0.5 * x * (1 + erf(x / sqrt(2)))
    return 0.5 * x * (1.0 + _erf_kernel(x * 0.7071067811865476))


def make_kernel(TB, P, H, L):
    assert P % H == 0
    dh = P // H
    scale = 1.0 / math.sqrt(dh)
    f32 = jnp.float32

    def mm(a, w):
        # single-pass bf16 MXU matmul, f32 accumulation (weights arrive bf16).
        return jnp.dot(a.astype(jnp.bfloat16), w, preferred_element_type=f32)

    def swap_halves(x):
        # partner-token rows: row i <-> row TB+i (token 0 <-> token 1)
        return jnp.concatenate([x[TB:], x[:TB]], axis=0)

    def kernel(e0_ref, e1_ref, hones_ref, wp_ref, bp_ref, wqkv_ref, bqkv_ref,
               wo_ref, bo_ref, ln1g_ref, ln1b_ref, w1_ref, b1_ref,
               w2_ref, b2_ref, ln2g_ref, ln2b_ref, wout0_ref, wout1_ref,
               bout_ref, out_ref):
        hones = hones_ref[...]                                    # (P, P) bf16

        # token-major token matrix (2TB, P): rows [0:TB)=token0, [TB:2TB)=token1
        e = jnp.concatenate([e0_ref[...], e1_ref[...]], axis=0)   # (2TB, E)
        x = mm(e, wp_ref[...]) + bp_ref[...]                      # (2TB, P) f32

        for l in range(L):                       # static unroll (L is small)
            # ---- fused QKV projection: one MXU launch per layer -------------
            qkv = mm(x, wqkv_ref[l]) + bqkv_ref[l]                # (2TB, 3P)
            q = qkv[:, 0:P] * scale
            k = qkv[:, P:2 * P]
            v = qkv[:, 2 * P:3 * P]
            qkv_sw = swap_halves(qkv)                             # partner token
            k_sw = qkv_sw[:, P:2 * P]
            v_sw = qkv_sw[:, 2 * P:3 * P]

            # ---- S=2 attention, all batches & heads at once ------------------
            # per-(row, head) scores broadcast over each head's dh lanes via a
            # segmented lane reduction (block-diagonal ones matmul).
            s_self = jnp.dot((q * k).astype(jnp.bfloat16), hones,
                             preferred_element_type=f32)          # (2TB, P)
            s_cross = jnp.dot((q * k_sw).astype(jnp.bfloat16), hones,
                              preferred_element_type=f32)         # (2TB, P)
            m = jnp.maximum(s_self, s_cross)
            e_s = jnp.exp(s_self - m)
            e_c = jnp.exp(s_cross - m)
            r = pl.reciprocal(e_s + e_c, approx=True)             # EUP slot
            attn = (e_s * r) * v + (e_c * r) * v_sw               # (2TB, P)

            attn = mm(attn, wo_ref[l]) + bo_ref[l]
            x = _layernorm(x + attn, ln1g_ref[l], ln1b_ref[l])    # post-norm

            # ---- feed-forward block ------------------------------------------
            h1 = _gelu_exact_kernel(mm(x, w1_ref[l]) + b1_ref[l])
            ff = mm(h1, w2_ref[l]) + b2_ref[l]
            x = _layernorm(x + ff, ln2g_ref[l], ln2b_ref[l])

        # ---- final linear over flattened (token0 | token1) features ----------
        out_ref[...] = (mm(x[:TB], wout0_ref[...]) + mm(x[TB:], wout1_ref[...])
                        + bout_ref[...])

    return kernel


def projected_attention_forward(emb_prot1, emb_prot2, params, *, num_heads,
                                row_block=None):
    B, _, E = emb_prot1.shape
    P = params["wp"].shape[1]
    L = params["wq"].shape[0]
    OUT = params["wout"].shape[-1]
    H = num_heads
    assert P % H == 0
    dh = P // H

    # ---- glue / weight repacking (wrapper-side, traced once) -----------------
    bf = lambda a: a.astype(jnp.bfloat16)
    e0 = bf(emb_prot1.reshape(B, E))
    e1 = bf(emb_prot2.reshape(B, E))

    # fused QKV weights/biases
    wqkv = bf(jnp.concatenate([params["wq"], params["wk"], params["wv"]], axis=-1))
    bqkv = jnp.concatenate([params["bq"], params["bk"], params["bv"]], axis=-1)

    # block-diagonal head-ones matrix: segmented lane-sum + per-head broadcast
    seg = jnp.arange(P) // dh
    head_ones = bf((seg[:, None] == seg[None, :]).astype(jnp.float32))  # (P, P)

    wout0 = bf(params["wout"][:P])          # token-0 half of the final linear
    wout1 = bf(params["wout"][P:])          # token-1 half

    # ---- batch tiling ---------------------------------------------------------
    # One grid step handles TB batch rows (2*TB token rows).  Working set per
    # step is tiny at these feature sizes, so the same TB fits v7x (64 MiB VMEM)
    # as well as v5e/v6e (128 MiB); sweep TB upward on v6e for very large B.
    if row_block is None:
        row_block = 512                      # multiple of 8 for large batches
    TB = B if (B <= row_block or B % 8 != 0) else row_block
    grid = (pl.cdiv(B, TB),)

    weights = [head_ones, bf(params["wp"]), params["bp"], wqkv, bqkv,
               bf(params["wo"]), params["bo"], params["ln1g"], params["ln1b"],
               bf(params["w1"]), params["b1"], bf(params["w2"]), params["b2"],
               params["ln2g"], params["ln2b"], wout0, wout1, params["bout"]]

    def resident(shape):                     # constant index_map -> VMEM-resident
        return pl.BlockSpec(shape, lambda i, _n=len(shape): (0,) * _n)

    in_specs = ([pl.BlockSpec((TB, E), lambda i: (i, 0)),
                 pl.BlockSpec((TB, E), lambda i: (i, 0))]
                + [resident(a.shape) for a in weights])
    out_spec = pl.BlockSpec((TB, OUT), lambda i: (i, 0))

    kernel = make_kernel(TB, P, H, L)
    return pl.pallas_call(
        kernel,
        out_shape=jax.ShapeDtypeStruct((B, OUT), jnp.float32),
        grid=grid,
        in_specs=in_specs,
        out_specs=out_spec,
        compiler_params=pltpu.CompilerParams(
            # batch axis is embarrassingly parallel -> v7x's two TensorCores
            # each take half the grid; harmless on single-TC v5e/v6e.
            dimension_semantics=("parallel",)),
    )(e0, e1, *weights)


def reference_forward(emb_prot1, emb_prot2, params, *, num_heads,
                      matmul_dtype=None):
    """Pure-JAX reference (standard reshape-based MHA).  matmul_dtype=bfloat16
    mirrors the kernel's MXU operand precision for a tight comparison."""
    H = num_heads
    B = emb_prot1.shape[0]
    P = params["wp"].shape[1]
    dh = P // H
    L = params["wq"].shape[0]

    def mm(eq, a, b):
        if matmul_dtype is not None:
            a, b = a.astype(matmul_dtype), b.astype(matmul_dtype)
        return jnp.einsum(eq, a, b, preferred_element_type=jnp.float32)

    x = jnp.concatenate([emb_prot1, emb_prot2], axis=1)            # (B, 2, E)
    x = mm("bse,ep->bsp", x, params["wp"]) + params["bp"]
    S = x.shape[1]
    for l in range(L):
        q = mm("bsp,pq->bsq", x, params["wq"][l]) + params["bq"][l]
        k = mm("bsp,pq->bsq", x, params["wk"][l]) + params["bk"][l]
        v = mm("bsp,pq->bsq", x, params["wv"][l]) + params["bv"][l]
        qh = q.reshape(B, S, H, dh).transpose(0, 2, 1, 3)
        kh = k.reshape(B, S, H, dh).transpose(0, 2, 1, 3)
        vh = v.reshape(B, S, H, dh).transpose(0, 2, 1, 3)
        s = mm("bhid,bhjd->bhij", qh, kh) / math.sqrt(dh)
        p = jax.nn.softmax(s, axis=-1)
        o = mm("bhij,bhjd->bhid", p, vh)
        o = o.transpose(0, 2, 1, 3).reshape(B, S, P)
        o = mm("bsp,pq->bsq", o, params["wo"][l]) + params["bo"][l]
        x = _layernorm(x + o, params["ln1g"][l], params["ln1b"][l])
        hdn = jax.nn.gelu(
            mm("bsp,pf->bsf", x, params["w1"][l]) + params["b1"][l],
            approximate=False)
        ff = mm("bsf,fp->bsp", hdn, params["w2"][l]) + params["b2"][l]
        x = _layernorm(x + ff, params["ln2g"][l], params["ln2b"][l])
    xf = x.reshape(B, S * P)
    return mm("bf,fo->bo", xf, params["wout"]) + params["bout"]


if __name__ == "__main__":
    # Small shapes consistent with the module:
    #   batch=2, embed_dim=32, projection_dim=16, num_heads=8, num_layers=2,
    #   dim_feedforward=64, out_dim=1
    B, E, P, H, L, F, OUT = 2, 32, 16, 8, 2, 64, 1

    key = jax.random.PRNGKey(0)
    ks = jax.random.split(key, 20)

    def rn(k, shape, scale=0.2):
        return scale * jax.random.normal(k, shape, dtype=jnp.float32)

    # Synthetic parameters (torch.nn.Linear weights transposed to (in, out);
    # biases kept 2-D / 3-D for TPU-friendly layouts).
    params = {
        "wp": rn(ks[0], (E, P)),
        "bp": rn(ks[1], (1, P), 0.05),
        "wq": rn(ks[2], (L, P, P)),
        "wk": rn(ks[3], (L, P, P)),
        "wv": rn(ks[4], (L, P, P)),
        "bq": rn(ks[5], (L, 1, P), 0.05),
        "bk": rn(ks[6], (L, 1, P), 0.05),
        "bv": rn(ks[7], (L, 1, P), 0.05),
        "wo": rn(ks[8], (L, P, P)),
        "bo": rn(ks[9], (L, 1, P), 0.05),
        "ln1g": jnp.ones((L, 1, P), jnp.float32),
        "ln1b": jnp.zeros((L, 1, P), jnp.float32),
        "w1": rn(ks[10], (L, P, F)),
        "b1": rn(ks[11], (L, 1, F), 0.05),
        "w2": rn(ks[12], (L, F, P)),
        "b2": rn(ks[13], (L, 1, P), 0.05),
        "ln2g": jnp.ones((L, 1, P), jnp.float32),
        "ln2b": jnp.zeros((L, 1, P), jnp.float32),
        "wout": rn(ks[14], (2 * P, OUT)),
        "bout": rn(ks[15], (1, OUT), 0.05),
    }

    emb_prot1 = jax.random.normal(ks[16], (B, 1, E), dtype=jnp.float32)
    emb_prot2 = jax.random.normal(ks[17], (B, 1, E), dtype=jnp.float32)

    out = projected_attention_forward(emb_prot1, emb_prot2, params, num_heads=H)
    out = jax.block_until_ready(out)

    # Tight check vs a reference that uses the same bf16 MXU operand precision,
    # plus a looser sanity check vs a full-f32 reference.
    ref_bf16 = reference_forward(emb_prot1, emb_prot2, params, num_heads=H,
                                 matmul_dtype=jnp.bfloat16)
    ref_f32 = reference_forward(emb_prot1, emb_prot2, params, num_heads=H)

    assert out.shape == (B, OUT)
    assert jnp.allclose(out, ref_bf16, atol=3e-2, rtol=3e-2), (out, ref_bf16)
    assert jnp.allclose(out, ref_f32, atol=1e-1, rtol=1e-1), (out, ref_f32)

    print("KERNEL_OK")
</pallas_src>

<mosaic_0001>
module attributes {stable_mosaic.version = 11 : i64} {
  func.func @kernel(%arg0: i32, %arg1: memref<2x32xbf16, #tpu.memory_space<vmem>>, %arg2: memref<2x32xbf16, #tpu.memory_space<vmem>>, %arg3: memref<16x16xbf16, #tpu.memory_space<vmem>>, %arg4: memref<32x16xbf16, #tpu.memory_space<vmem>>, %arg5: memref<1x16xf32, #tpu.memory_space<vmem>>, %arg6: memref<2x16x48xbf16, #tpu.memory_space<vmem>>, %arg7: memref<2x1x48xf32, #tpu.memory_space<vmem>>, %arg8: memref<2x16x16xbf16, #tpu.memory_space<vmem>>, %arg9: memref<2x1x16xf32, #tpu.memory_space<vmem>>, %arg10: memref<2x1x16xf32, #tpu.memory_space<vmem>>, %arg11: memref<2x1x16xf32, #tpu.memory_space<vmem>>, %arg12: memref<2x16x64xbf16, #tpu.memory_space<vmem>>, %arg13: memref<2x1x64xf32, #tpu.memory_space<vmem>>, %arg14: memref<2x64x16xbf16, #tpu.memory_space<vmem>>, %arg15: memref<2x1x16xf32, #tpu.memory_space<vmem>>, %arg16: memref<2x1x16xf32, #tpu.memory_space<vmem>>, %arg17: memref<2x1x16xf32, #tpu.memory_space<vmem>>, %arg18: memref<16x1xbf16, #tpu.memory_space<vmem>>, %arg19: memref<16x1xbf16, #tpu.memory_space<vmem>>, %arg20: memref<1x1xf32, #tpu.memory_space<vmem>>, %arg21: memref<2x1xf32, #tpu.memory_space<vmem>>) attributes {dimension_semantics = [#tpu.dimension_semantics<parallel>], iteration_bounds = array<i64: 1>, scalar_prefetch = 0 : i64, scratch_operands = 0 : i64, tpu.core_type = #tpu.core_type<tc>, window_params = [{transform_indices = @transform_0, window_bounds = array<i64: 2, 32>}, {transform_indices = @transform_1, window_bounds = array<i64: 2, 32>}, {pipeline_mode = #tpu.pipeline_mode<synchronous>, transform_indices = @transform_2, window_bounds = array<i64: 16, 16>}, {pipeline_mode = #tpu.pipeline_mode<synchronous>, transform_indices = @transform_3, window_bounds = array<i64: 32, 16>}, {pipeline_mode = #tpu.pipeline_mode<synchronous>, transform_indices = @transform_4, window_bounds = array<i64: 1, 16>}, {pipeline_mode = #tpu.pipeline_mode<synchronous>, transform_indices = @transform_5, window_bounds = array<i64: 2, 16, 48>}, {pipeline_mode = #tpu.pipeline_mode<synchronous>, transform_indices = @transform_6, window_bounds = array<i64: 2, 1, 48>}, {pipeline_mode = #tpu.pipeline_mode<synchronous>, transform_indices = @transform_7, window_bounds = array<i64: 2, 16, 16>}, {pipeline_mode = #tpu.pipeline_mode<synchronous>, transform_indices = @transform_8, window_bounds = array<i64: 2, 1, 16>}, {pipeline_mode = #tpu.pipeline_mode<synchronous>, transform_indices = @transform_9, window_bounds = array<i64: 2, 1, 16>}, {pipeline_mode = #tpu.pipeline_mode<synchronous>, transform_indices = @transform_10, window_bounds = array<i64: 2, 1, 16>}, {pipeline_mode = #tpu.pipeline_mode<synchronous>, transform_indices = @transform_11, window_bounds = array<i64: 2, 16, 64>}, {pipeline_mode = #tpu.pipeline_mode<synchronous>, transform_indices = @transform_12, window_bounds = array<i64: 2, 1, 64>}, {pipeline_mode = #tpu.pipeline_mode<synchronous>, transform_indices = @transform_13, window_bounds = array<i64: 2, 64, 16>}, {pipeline_mode = #tpu.pipeline_mode<synchronous>, transform_indices = @transform_14, window_bounds = array<i64: 2, 1, 16>}, {pipeline_mode = #tpu.pipeline_mode<synchronous>, transform_indices = @transform_15, window_bounds = array<i64: 2, 1, 16>}, {pipeline_mode = #tpu.pipeline_mode<synchronous>, transform_indices = @transform_16, window_bounds = array<i64: 2, 1, 16>}, {pipeline_mode = #tpu.pipeline_mode<synchronous>, transform_indices = @transform_17, window_bounds = array<i64: 16, 1>}, {pipeline_mode = #tpu.pipeline_mode<synchronous>, transform_indices = @transform_18, window_bounds = array<i64: 16, 1>}, {pipeline_mode = #tpu.pipeline_mode<synchronous>, transform_indices = @transform_19, window_bounds = array<i64: 1, 1>}, {transform_indices = @transform_20, window_bounds = array<i64: 2, 1>}]} {
    %c0 = arith.constant 0 : index
    %c0_0 = arith.constant 0 : index
    %0 = vector.load %arg3[%c0, %c0_0] : memref<16x16xbf16, #tpu.memory_space<vmem>>, vector<16x16xbf16>
    %c0_1 = arith.constant 0 : index
    %c0_2 = arith.constant 0 : index
    %1 = vector.load %arg1[%c0_1, %c0_2] : memref<2x32xbf16, #tpu.memory_space<vmem>>, vector<2x32xbf16>
    %c0_3 = arith.constant 0 : index
    %c0_4 = arith.constant 0 : index
    %2 = vector.load %arg2[%c0_3, %c0_4] : memref<2x32xbf16, #tpu.memory_space<vmem>>, vector<2x32xbf16>
    %3 = tpu.concatenate %1, %2 in 0 : vector<2x32xbf16>, vector<2x32xbf16> -> vector<4x32xbf16>
    %c0_5 = arith.constant 0 : index
    %c0_6 = arith.constant 0 : index
    %4 = vector.load %arg4[%c0_5, %c0_6] : memref<32x16xbf16, #tpu.memory_space<vmem>>, vector<32x16xbf16>
    %cst = arith.constant dense<0.000000e+00> : vector<4x16xf32>
    %5 = tpu.matmul %3, %4, %cst {dimension_numbers = #tpu.dot_dimension_numbers<[1], [0], [0], [1], [0, 0, 1, 1], [], []>} : vector<4x32xbf16>, vector<32x16xbf16>, vector<4x16xf32> -> vector<4x16xf32>
    %c0_7 = arith.constant 0 : index
    %c0_8 = arith.constant 0 : index
    %6 = vector.load %arg5[%c0_7, %c0_8] : memref<1x16xf32, #tpu.memory_space<vmem>>, vector<1x16xf32>
    %7 = vector.broadcast %6 : vector<1x16xf32> to vector<4x16xf32>
    %8 = arith.addf %5, %7 : vector<4x16xf32>
    %c0_9 = arith.constant 0 : index
    %c0_10 = arith.constant 0 : index
    %c0_11 = arith.constant 0 : index
    %9 = vector.load %arg6[%c0_9, %c0_10, %c0_11] : memref<2x16x48xbf16, #tpu.memory_space<vmem>>, vector<1x16x48xbf16>
    %10 = vector.shape_cast %9 : vector<1x16x48xbf16> to vector<16x48xbf16>
    %11 = arith.truncf %8 : vector<4x16xf32> to vector<4x16xbf16>
    %cst_12 = arith.constant dense<0.000000e+00> : vector<4x48xf32>
    %12 = tpu.matmul %11, %10, %cst_12 {dimension_numbers = #tpu.dot_dimension_numbers<[1], [0], [0], [1], [0, 0, 1, 1], [], []>} : vector<4x16xbf16>, vector<16x48xbf16>, vector<4x48xf32> -> vector<4x48xf32>
    %c0_13 = arith.constant 0 : index
    %c0_14 = arith.constant 0 : index
    %c0_15 = arith.constant 0 : index
    %13 = vector.load %arg7[%c0_13, %c0_14, %c0_15] : memref<2x1x48xf32, #tpu.memory_space<vmem>>, vector<1x1x48xf32>
    %14 = vector.shape_cast %13 : vector<1x1x48xf32> to vector<1x48xf32>
    %15 = vector.broadcast %14 : vector<1x48xf32> to vector<4x48xf32>
    %16 = arith.addf %12, %15 : vector<4x48xf32>
    %17 = vector.extract_strided_slice %16 {offsets = [0, 0], sizes = [4, 16], strides = [1, 1]} : vector<4x48xf32> to vector<4x16xf32>
    %cst_16 = arith.constant 0.707106769 : f32
    %18 = vector.broadcast %cst_16 : f32 to vector<4x16xf32>
    %19 = arith.mulf %17, %18 : vector<4x16xf32>
    %20 = vector.extract_strided_slice %16 {offsets = [0, 16], sizes = [4, 16], strides = [1, 1]} : vector<4x48xf32> to vector<4x16xf32>
    %21 = vector.extract_strided_slice %16 {offsets = [0, 32], sizes = [4, 16], strides = [1, 1]} : vector<4x48xf32> to vector<4x16xf32>
    %22 = vector.extract_strided_slice %16 {offsets = [2, 0], sizes = [2, 48], strides = [1, 1]} : vector<4x48xf32> to vector<2x48xf32>
    %23 = vector.extract_strided_slice %16 {offsets = [0, 0], sizes = [2, 48], strides = [1, 1]} : vector<4x48xf32> to vector<2x48xf32>
    %24 = tpu.concatenate %22, %23 in 0 : vector<2x48xf32>, vector<2x48xf32> -> vector<4x48xf32>
    %25 = vector.extract_strided_slice %24 {offsets = [0, 16], sizes = [4, 16], strides = [1, 1]} : vector<4x48xf32> to vector<4x16xf32>
    %26 = vector.extract_strided_slice %24 {offsets = [0, 32], sizes = [4, 16], strides = [1, 1]} : vector<4x48xf32> to vector<4x16xf32>
    %27 = arith.mulf %19, %20 : vector<4x16xf32>
    %28 = arith.truncf %27 : vector<4x16xf32> to vector<4x16xbf16>
    %cst_17 = arith.constant dense<0.000000e+00> : vector<4x16xf32>
    %29 = tpu.matmul %28, %0, %cst_17 {dimension_numbers = #tpu.dot_dimension_numbers<[1], [0], [0], [1], [0, 0, 1, 1], [], []>} : vector<4x16xbf16>, vector<16x16xbf16>, vector<4x16xf32> -> vector<4x16xf32>
    %30 = arith.mulf %19, %25 : vector<4x16xf32>
    %31 = arith.truncf %30 : vector<4x16xf32> to vector<4x16xbf16>
    %cst_18 = arith.constant dense<0.000000e+00> : vector<4x16xf32>
    %32 = tpu.matmul %31, %0, %cst_18 {dimension_numbers = #tpu.dot_dimension_numbers<[1], [0], [0], [1], [0, 0, 1, 1], [], []>} : vector<4x16xbf16>, vector<16x16xbf16>, vector<4x16xf32> -> vector<4x16xf32>
    %33 = arith.maximumf %29, %32 : vector<4x16xf32>
    %34 = arith.subf %29, %33 : vector<4x16xf32>
    %35 = math.exp %34 : vector<4x16xf32>
    %36 = arith.subf %32, %33 : vector<4x16xf32>
    %37 = math.exp %36 : vector<4x16xf32>
    %38 = arith.addf %35, %37 : vector<4x16xf32>
    %39 = tpu.reciprocal %38 {approx = true} : vector<4x16xf32> -> vector<4x16xf32>
    %40 = arith.mulf %35, %39 : vector<4x16xf32>
    %41 = arith.mulf %40, %21 : vector<4x16xf32>
    %42 = arith.mulf %37, %39 : vector<4x16xf32>
    %43 = arith.mulf %42, %26 : vector<4x16xf32>
    %44 = arith.addf %41, %43 : vector<4x16xf32>
    %c0_19 = arith.constant 0 : index
    %c0_20 = arith.constant 0 : index
    %c0_21 = arith.constant 0 : index
    %45 = vector.load %arg8[%c0_19, %c0_20, %c0_21] : memref<2x16x16xbf16, #tpu.memory_space<vmem>>, vector<1x16x16xbf16>
    %46 = vector.shape_cast %45 : vector<1x16x16xbf16> to vector<16x16xbf16>
    %47 = arith.truncf %44 : vector<4x16xf32> to vector<4x16xbf16>
    %cst_22 = arith.constant dense<0.000000e+00> : vector<4x16xf32>
    %48 = tpu.matmul %47, %46, %cst_22 {dimension_numbers = #tpu.dot_dimension_numbers<[1], [0], [0], [1], [0, 0, 1, 1], [], []>} : vector<4x16xbf16>, vector<16x16xbf16>, vector<4x16xf32> -> vector<4x16xf32>
    %c0_23 = arith.constant 0 : index
    %c0_24 = arith.constant 0 : index
    %c0_25 = arith.constant 0 : index
    %49 = vector.load %arg9[%c0_23, %c0_24, %c0_25] : memref<2x1x16xf32, #tpu.memory_space<vmem>>, vector<1x1x16xf32>
    %50 = vector.shape_cast %49 : vector<1x1x16xf32> to vector<1x16xf32>
    %51 = vector.broadcast %50 : vector<1x16xf32> to vector<4x16xf32>
    %52 = arith.addf %48, %51 : vector<4x16xf32>
    %53 = arith.addf %8, %52 : vector<4x16xf32>
    %c0_26 = arith.constant 0 : index
    %c0_27 = arith.constant 0 : index
    %c0_28 = arith.constant 0 : index
    %54 = vector.load %arg10[%c0_26, %c0_27, %c0_28] : memref<2x1x16xf32, #tpu.memory_space<vmem>>, vector<1x1x16xf32>
    %55 = vector.shape_cast %54 : vector<1x1x16xf32> to vector<1x16xf32>
    %c0_29 = arith.constant 0 : index
    %c0_30 = arith.constant 0 : index
    %c0_31 = arith.constant 0 : index
    %56 = vector.load %arg11[%c0_29, %c0_30, %c0_31] : memref<2x1x16xf32, #tpu.memory_space<vmem>>, vector<1x1x16xf32>
    %57 = vector.shape_cast %56 : vector<1x1x16xf32> to vector<1x16xf32>
    %cst_32 = arith.constant dense<0.000000e+00> : vector<4xf32>
    %58 = vector.multi_reduction <add>, %53, %cst_32 [1] : vector<4x16xf32> to vector<4xf32>
    %59 = vector.shape_cast %58 : vector<4xf32> to vector<4x1xf32>
    %cst_33 = arith.constant 1.600000e+01 : f32
    %60 = vector.broadcast %cst_33 : f32 to vector<4x1xf32>
    %61 = arith.divf %59, %60 : vector<4x1xf32>
    %62 = vector.broadcast %61 : vector<4x1xf32> to vector<4x16xf32>
    %63 = arith.subf %53, %62 : vector<4x16xf32>
    %64 = arith.mulf %63, %63 : vector<4x16xf32>
    %cst_34 = arith.constant dense<0.000000e+00> : vector<4xf32>
    %65 = vector.multi_reduction <add>, %64, %cst_34 [1] : vector<4x16xf32> to vector<4xf32>
    %66 = vector.shape_cast %65 : vector<4xf32> to vector<4x1xf32>
    %cst_35 = arith.constant 1.600000e+01 : f32
    %67 = vector.broadcast %cst_35 : f32 to vector<4x1xf32>
    %68 = arith.divf %66, %67 : vector<4x1xf32>
    %cst_36 = arith.constant 9.99999974E-6 : f32
    %69 = vector.broadcast %cst_36 : f32 to vector<4x1xf32>
    %70 = arith.addf %68, %69 : vector<4x1xf32>
    %71 = math.rsqrt %70 : vector<4x1xf32>
    %72 = vector.broadcast %71 : vector<4x1xf32> to vector<4x16xf32>
    %73 = arith.mulf %63, %72 : vector<4x16xf32>
    %74 = vector.broadcast %55 : vector<1x16xf32> to vector<4x16xf32>
    %75 = arith.mulf %73, %74 : vector<4x16xf32>
    %76 = vector.broadcast %57 : vector<1x16xf32> to vector<4x16xf32>
    %77 = arith.addf %75, %76 : vector<4x16xf32>
    %c0_37 = arith.constant 0 : index
    %c0_38 = arith.constant 0 : index
    %c0_39 = arith.constant 0 : index
    %78 = vector.load %arg12[%c0_37, %c0_38, %c0_39] : memref<2x16x64xbf16, #tpu.memory_space<vmem>>, vector<1x16x64xbf16>
    %79 = vector.shape_cast %78 : vector<1x16x64xbf16> to vector<16x64xbf16>
    %80 = arith.truncf %77 : vector<4x16xf32> to vector<4x16xbf16>
    %cst_40 = arith.constant dense<0.000000e+00> : vector<4x64xf32>
    %81 = tpu.matmul %80, %79, %cst_40 {dimension_numbers = #tpu.dot_dimension_numbers<[1], [0], [0], [1], [0, 0, 1, 1], [], []>} : vector<4x16xbf16>, vector<16x64xbf16>, vector<4x64xf32> -> vector<4x64xf32>
    %c0_41 = arith.constant 0 : index
    %c0_42 = arith.constant 0 : index
    %c0_43 = arith.constant 0 : index
    %82 = vector.load %arg13[%c0_41, %c0_42, %c0_43] : memref<2x1x64xf32, #tpu.memory_space<vmem>>, vector<1x1x64xf32>
    %83 = vector.shape_cast %82 : vector<1x1x64xf32> to vector<1x64xf32>
    %84 = vector.broadcast %83 : vector<1x64xf32> to vector<4x64xf32>
    %85 = arith.addf %81, %84 : vector<4x64xf32>
    %cst_44 = arith.constant 5.000000e-01 : f32
    %86 = vector.broadcast %cst_44 : f32 to vector<4x64xf32>
    %87 = arith.mulf %86, %85 : vector<4x64xf32>
    %cst_45 = arith.constant 0.707106769 : f32
    %88 = vector.broadcast %cst_45 : f32 to vector<4x64xf32>
    %89 = arith.mulf %85, %88 : vector<4x64xf32>
    %cst_46 = arith.constant 0.000000e+00 : f32
    %90 = vector.broadcast %cst_46 : f32 to vector<4x64xf32>
    %91 = arith.cmpf oge, %89, %90 : vector<4x64xf32>
    %cst_47 = arith.constant 1.000000e+00 : f32
    %cst_48 = arith.constant -1.000000e+00 : f32
    %92 = vector.broadcast %cst_47 : f32 to vector<4x64xf32>
    %93 = vector.broadcast %cst_48 : f32 to vector<4x64xf32>
    %94 = arith.select %91, %92, %93 : vector<4x64xi1>, vector<4x64xf32>
    %95 = math.absf %89 : vector<4x64xf32>
    %cst_49 = arith.constant 0.327591091 : f32
    %96 = vector.broadcast %cst_49 : f32 to vector<4x64xf32>
    %97 = arith.mulf %96, %95 : vector<4x64xf32>
    %cst_50 = arith.constant 1.000000e+00 : f32
    %98 = vector.broadcast %cst_50 : f32 to vector<4x64xf32>
    %99 = arith.addf %98, %97 : vector<4x64xf32>
    %100 = tpu.reciprocal %99 {approx = true} : vector<4x64xf32> -> vector<4x64xf32>
    %cst_51 = arith.constant 1.06140542 : f32
    %101 = vector.broadcast %cst_51 : f32 to vector<4x64xf32>
    %102 = arith.mulf %101, %100 : vector<4x64xf32>
    %cst_52 = arith.constant -1.45315206 : f32
    %103 = vector.broadcast %cst_52 : f32 to vector<4x64xf32>
    %104 = arith.addf %102, %103 : vector<4x64xf32>
    %105 = arith.mulf %104, %100 : vector<4x64xf32>
    %cst_53 = arith.constant 1.42141378 : f32
    %106 = vector.broadcast %cst_53 : f32 to vector<4x64xf32>
    %107 = arith.addf %105, %106 : vector<4x64xf32>
    %108 = arith.mulf %107, %100 : vector<4x64xf32>
    %cst_54 = arith.constant -0.284496725 : f32
    %109 = vector.broadcast %cst_54 : f32 to vector<4x64xf32>
    %110 = arith.addf %108, %109 : vector<4x64xf32>
    %111 = arith.mulf %110, %100 : vector<4x64xf32>
    %cst_55 = arith.constant 0.254829586 : f32
    %112 = vector.broadcast %cst_55 : f32 to vector<4x64xf32>
    %113 = arith.addf %111, %112 : vector<4x64xf32>
    %114 = arith.mulf %113, %100 : vector<4x64xf32>
    %cst_56 = arith.constant 0.000000e+00 : f32
    %115 = vector.broadcast %cst_56 : f32 to vector<4x64xf32>
    %116 = arith.subf %115, %95 : vector<4x64xf32>
    %117 = arith.mulf %116, %95 : vector<4x64xf32>
    %118 = math.exp %117 : vector<4x64xf32>
    %119 = arith.mulf %114, %118 : vector<4x64xf32>
    %cst_57 = arith.constant 1.000000e+00 : f32
    %120 = vector.broadcast %cst_57 : f32 to vector<4x64xf32>
    %121 = arith.subf %120, %119 : vector<4x64xf32>
    %122 = arith.mulf %94, %121 : vector<4x64xf32>
    %cst_58 = arith.constant 1.000000e+00 : f32
    %123 = vector.broadcast %cst_58 : f32 to vector<4x64xf32>
    %124 = arith.addf %123, %122 : vector<4x64xf32>
    %125 = arith.mulf %87, %124 : vector<4x64xf32>
    %c0_59 = arith.constant 0 : index
    %c0_60 = arith.constant 0 : index
    %c0_61 = arith.constant 0 : index
    %126 = vector.load %arg14[%c0_59, %c0_60, %c0_61] : memref<2x64x16xbf16, #tpu.memory_space<vmem>>, vector<1x64x16xbf16>
    %127 = vector.shape_cast %126 : vector<1x64x16xbf16> to vector<64x16xbf16>
    %128 = arith.truncf %125 : vector<4x64xf32> to vector<4x64xbf16>
    %cst_62 = arith.constant dense<0.000000e+00> : vector<4x16xf32>
    %129 = tpu.matmul %128, %127, %cst_62 {dimension_numbers = #tpu.dot_dimension_numbers<[1], [0], [0], [1], [0, 0, 1, 1], [], []>} : vector<4x64xbf16>, vector<64x16xbf16>, vector<4x16xf32> -> vector<4x16xf32>
    %c0_63 = arith.constant 0 : index
    %c0_64 = arith.constant 0 : index
    %c0_65 = arith.constant 0 : index
    %130 = vector.load %arg15[%c0_63, %c0_64, %c0_65] : memref<2x1x16xf32, #tpu.memory_space<vmem>>, vector<1x1x16xf32>
    %131 = vector.shape_cast %130 : vector<1x1x16xf32> to vector<1x16xf32>
    %132 = vector.broadcast %131 : vector<1x16xf32> to vector<4x16xf32>
    %133 = arith.addf %129, %132 : vector<4x16xf32>
    %134 = arith.addf %77, %133 : vector<4x16xf32>
    %c0_66 = arith.constant 0 : index
    %c0_67 = arith.constant 0 : index
    %c0_68 = arith.constant 0 : index
    %135 = vector.load %arg16[%c0_66, %c0_67, %c0_68] : memref<2x1x16xf32, #tpu.memory_space<vmem>>, vector<1x1x16xf32>
    %136 = vector.shape_cast %135 : vector<1x1x16xf32> to vector<1x16xf32>
    %c0_69 = arith.constant 0 : index
    %c0_70 = arith.constant 0 : index
    %c0_71 = arith.constant 0 : index
    %137 = vector.load %arg17[%c0_69, %c0_70, %c0_71] : memref<2x1x16xf32, #tpu.memory_space<vmem>>, vector<1x1x16xf32>
    %138 = vector.shape_cast %137 : vector<1x1x16xf32> to vector<1x16xf32>
    %cst_72 = arith.constant dense<0.000000e+00> : vector<4xf32>
    %139 = vector.multi_reduction <add>, %134, %cst_72 [1] : vector<4x16xf32> to vector<4xf32>
    %140 = vector.shape_cast %139 : vector<4xf32> to vector<4x1xf32>
    %cst_73 = arith.constant 1.600000e+01 : f32
    %141 = vector.broadcast %cst_73 : f32 to vector<4x1xf32>
    %142 = arith.divf %140, %141 : vector<4x1xf32>
    %143 = vector.broadcast %142 : vector<4x1xf32> to vector<4x16xf32>
    %144 = arith.subf %134, %143 : vector<4x16xf32>
    %145 = arith.mulf %144, %144 : vector<4x16xf32>
    %cst_74 = arith.constant dense<0.000000e+00> : vector<4xf32>
    %146 = vector.multi_reduction <add>, %145, %cst_74 [1] : vector<4x16xf32> to vector<4xf32>
    %147 = vector.shape_cast %146 : vector<4xf32> to vector<4x1xf32>
    %cst_75 = arith.constant 1.600000e+01 : f32
    %148 = vector.broadcast %cst_75 : f32 to vector<4x1xf32>
    %149 = arith.divf %147, %148 : vector<4x1xf32>
    %cst_76 = arith.constant 9.99999974E-6 : f32
    %150 = vector.broadcast %cst_76 : f32 to vector<4x1xf32>
    %151 = arith.addf %149, %150 : vector<4x1xf32>
    %152 = math.rsqrt %151 : vector<4x1xf32>
    %153 = vector.broadcast %152 : vector<4x1xf32> to vector<4x16xf32>
    %154 = arith.mulf %144, %153 : vector<4x16xf32>
    %155 = vector.broadcast %136 : vector<1x16xf32> to vector<4x16xf32>
    %156 = arith.mulf %154, %155 : vector<4x16xf32>
    %157 = vector.broadcast %138 : vector<1x16xf32> to vector<4x16xf32>
    %158 = arith.addf %156, %157 : vector<4x16xf32>
    %c1 = arith.constant 1 : index
    %c0_77 = arith.constant 0 : index
    %c0_78 = arith.constant 0 : index
    %159 = vector.load %arg6[%c1, %c0_77, %c0_78] : memref<2x16x48xbf16, #tpu.memory_space<vmem>>, vector<1x16x48xbf16>
    %160 = vector.shape_cast %159 : vector<1x16x48xbf16> to vector<16x48xbf16>
    %161 = arith.truncf %158 : vector<4x16xf32> to vector<4x16xbf16>
    %cst_79 = arith.constant dense<0.000000e+00> : vector<4x48xf32>
    %162 = tpu.matmul %161, %160, %cst_79 {dimension_numbers = #tpu.dot_dimension_numbers<[1], [0], [0], [1], [0, 0, 1, 1], [], []>} : vector<4x16xbf16>, vector<16x48xbf16>, vector<4x48xf32> -> vector<4x48xf32>
    %c1_80 = arith.constant 1 : index
    %c0_81 = arith.constant 0 : index
    %c0_82 = arith.constant 0 : index
    %163 = vector.load %arg7[%c1_80, %c0_81, %c0_82] : memref<2x1x48xf32, #tpu.memory_space<vmem>>, vector<1x1x48xf32>
    %164 = vector.shape_cast %163 : vector<1x1x48xf32> to vector<1x48xf32>
    %165 = vector.broadcast %164 : vector<1x48xf32> to vector<4x48xf32>
    %166 = arith.addf %162, %165 : vector<4x48xf32>
    %167 = vector.extract_strided_slice %166 {offsets = [0, 0], sizes = [4, 16], strides = [1, 1]} : vector<4x48xf32> to vector<4x16xf32>
    %cst_83 = arith.constant 0.707106769 : f32
    %168 = vector.broadcast %cst_83 : f32 to vector<4x16xf32>
    %169 = arith.mulf %167, %168 : vector<4x16xf32>
    %170 = vector.extract_strided_slice %166 {offsets = [0, 16], sizes = [4, 16], strides = [1, 1]} : vector<4x48xf32> to vector<4x16xf32>
    %171 = vector.extract_strided_slice %166 {offsets = [0, 32], sizes = [4, 16], strides = [1, 1]} : vector<4x48xf32> to vector<4x16xf32>
    %172 = vector.extract_strided_slice %166 {offsets = [2, 0], sizes = [2, 48], strides = [1, 1]} : vector<4x48xf32> to vector<2x48xf32>
    %173 = vector.extract_strided_slice %166 {offsets = [0, 0], sizes = [2, 48], strides = [1, 1]} : vector<4x48xf32> to vector<2x48xf32>
    %174 = tpu.concatenate %172, %173 in 0 : vector<2x48xf32>, vector<2x48xf32> -> vector<4x48xf32>
    %175 = vector.extract_strided_slice %174 {offsets = [0, 16], sizes = [4, 16], strides = [1, 1]} : vector<4x48xf32> to vector<4x16xf32>
    %176 = vector.extract_strided_slice %174 {offsets = [0, 32], sizes = [4, 16], strides = [1, 1]} : vector<4x48xf32> to vector<4x16xf32>
    %177 = arith.mulf %169, %170 : vector<4x16xf32>
    %178 = arith.truncf %177 : vector<4x16xf32> to vector<4x16xbf16>
    %cst_84 = arith.constant dense<0.000000e+00> : vector<4x16xf32>
    %179 = tpu.matmul %178, %0, %cst_84 {dimension_numbers = #tpu.dot_dimension_numbers<[1], [0], [0], [1], [0, 0, 1, 1], [], []>} : vector<4x16xbf16>, vector<16x16xbf16>, vector<4x16xf32> -> vector<4x16xf32>
    %180 = arith.mulf %169, %175 : vector<4x16xf32>
    %181 = arith.truncf %180 : vector<4x16xf32> to vector<4x16xbf16>
    %cst_85 = arith.constant dense<0.000000e+00> : vector<4x16xf32>
    %182 = tpu.matmul %181, %0, %cst_85 {dimension_numbers = #tpu.dot_dimension_numbers<[1], [0], [0], [1], [0, 0, 1, 1], [], []>} : vector<4x16xbf16>, vector<16x16xbf16>, vector<4x16xf32> -> vector<4x16xf32>
    %183 = arith.maximumf %179, %182 : vector<4x16xf32>
    %184 = arith.subf %179, %183 : vector<4x16xf32>
    %185 = math.exp %184 : vector<4x16xf32>
    %186 = arith.subf %182, %183 : vector<4x16xf32>
    %187 = math.exp %186 : vector<4x16xf32>
    %188 = arith.addf %185, %187 : vector<4x16xf32>
    %189 = tpu.reciprocal %188 {approx = true} : vector<4x16xf32> -> vector<4x16xf32>
    %190 = arith.mulf %185, %189 : vector<4x16xf32>
    %191 = arith.mulf %190, %171 : vector<4x16xf32>
    %192 = arith.mulf %187, %189 : vector<4x16xf32>
    %193 = arith.mulf %192, %176 : vector<4x16xf32>
    %194 = arith.addf %191, %193 : vector<4x16xf32>
    %c1_86 = arith.constant 1 : index
    %c0_87 = arith.constant 0 : index
    %c0_88 = arith.constant 0 : index
    %195 = vector.load %arg8[%c1_86, %c0_87, %c0_88] : memref<2x16x16xbf16, #tpu.memory_space<vmem>>, vector<1x16x16xbf16>
    %196 = vector.shape_cast %195 : vector<1x16x16xbf16> to vector<16x16xbf16>
    %197 = arith.truncf %194 : vector<4x16xf32> to vector<4x16xbf16>
    %cst_89 = arith.constant dense<0.000000e+00> : vector<4x16xf32>
    %198 = tpu.matmul %197, %196, %cst_89 {dimension_numbers = #tpu.dot_dimension_numbers<[1], [0], [0], [1], [0, 0, 1, 1], [], []>} : vector<4x16xbf16>, vector<16x16xbf16>, vector<4x16xf32> -> vector<4x16xf32>
    %c1_90 = arith.constant 1 : index
    %c0_91 = arith.constant 0 : index
    %c0_92 = arith.constant 0 : index
    %199 = vector.load %arg9[%c1_90, %c0_91, %c0_92] : memref<2x1x16xf32, #tpu.memory_space<vmem>>, vector<1x1x16xf32>
    %200 = vector.shape_cast %199 : vector<1x1x16xf32> to vector<1x16xf32>
    %201 = vector.broadcast %200 : vector<1x16xf32> to vector<4x16xf32>
    %202 = arith.addf %198, %201 : vector<4x16xf32>
    %203 = arith.addf %158, %202 : vector<4x16xf32>
    %c1_93 = arith.constant 1 : index
    %c0_94 = arith.constant 0 : index
    %c0_95 = arith.constant 0 : index
    %204 = vector.load %arg10[%c1_93, %c0_94, %c0_95] : memref<2x1x16xf32, #tpu.memory_space<vmem>>, vector<1x1x16xf32>
    %205 = vector.shape_cast %204 : vector<1x1x16xf32> to vector<1x16xf32>
    %c1_96 = arith.constant 1 : index
    %c0_97 = arith.constant 0 : index
    %c0_98 = arith.constant 0 : index
    %206 = vector.load %arg11[%c1_96, %c0_97, %c0_98] : memref<2x1x16xf32, #tpu.memory_space<vmem>>, vector<1x1x16xf32>
    %207 = vector.shape_cast %206 : vector<1x1x16xf32> to vector<1x16xf32>
    %cst_99 = arith.constant dense<0.000000e+00> : vector<4xf32>
    %208 = vector.multi_reduction <add>, %203, %cst_99 [1] : vector<4x16xf32> to vector<4xf32>
    %209 = vector.shape_cast %208 : vector<4xf32> to vector<4x1xf32>
    %cst_100 = arith.constant 1.600000e+01 : f32
    %210 = vector.broadcast %cst_100 : f32 to vector<4x1xf32>
    %211 = arith.divf %209, %210 : vector<4x1xf32>
    %212 = vector.broadcast %211 : vector<4x1xf32> to vector<4x16xf32>
    %213 = arith.subf %203, %212 : vector<4x16xf32>
    %214 = arith.mulf %213, %213 : vector<4x16xf32>
    %cst_101 = arith.constant dense<0.000000e+00> : vector<4xf32>
    %215 = vector.multi_reduction <add>, %214, %cst_101 [1] : vector<4x16xf32> to vector<4xf32>
    %216 = vector.shape_cast %215 : vector<4xf32> to vector<4x1xf32>
    %cst_102 = arith.constant 1.600000e+01 : f32
    %217 = vector.broadcast %cst_102 : f32 to vector<4x1xf32>
    %218 = arith.divf %216, %217 : vector<4x1xf32>
    %cst_103 = arith.constant 9.99999974E-6 : f32
    %219 = vector.broadcast %cst_103 : f32 to vector<4x1xf32>
    %220 = arith.addf %218, %219 : vector<4x1xf32>
    %221 = math.rsqrt %220 : vector<4x1xf32>
    %222 = vector.broadcast %221 : vector<4x1xf32> to vector<4x16xf32>
    %223 = arith.mulf %213, %222 : vector<4x16xf32>
    %224 = vector.broadcast %205 : vector<1x16xf32> to vector<4x16xf32>
    %225 = arith.mulf %223, %224 : vector<4x16xf32>
    %226 = vector.broadcast %207 : vector<1x16xf32> to vector<4x16xf32>
    %227 = arith.addf %225, %226 : vector<4x16xf32>
    %c1_104 = arith.constant 1 : index
    %c0_105 = arith.constant 0 : index
    %c0_106 = arith.constant 0 : index
    %228 = vector.load %arg12[%c1_104, %c0_105, %c0_106] : memref<2x16x64xbf16, #tpu.memory_space<vmem>>, vector<1x16x64xbf16>
    %229 = vector.shape_cast %228 : vector<1x16x64xbf16> to vector<16x64xbf16>
    %230 = arith.truncf %227 : vector<4x16xf32> to vector<4x16xbf16>
    %cst_107 = arith.constant dense<0.000000e+00> : vector<4x64xf32>
    %231 = tpu.matmul %230, %229, %cst_107 {dimension_numbers = #tpu.dot_dimension_numbers<[1], [0], [0], [1], [0, 0, 1, 1], [], []>} : vector<4x16xbf16>, vector<16x64xbf16>, vector<4x64xf32> -> vector<4x64xf32>
    %c1_108 = arith.constant 1 : index
    %c0_109 = arith.constant 0 : index
    %c0_110 = arith.constant 0 : index
    %232 = vector.load %arg13[%c1_108, %c0_109, %c0_110] : memref<2x1x64xf32, #tpu.memory_space<vmem>>, vector<1x1x64xf32>
    %233 = vector.shape_cast %232 : vector<1x1x64xf32> to vector<1x64xf32>
    %234 = vector.broadcast %233 : vector<1x64xf32> to vector<4x64xf32>
    %235 = arith.addf %231, %234 : vector<4x64xf32>
    %cst_111 = arith.constant 5.000000e-01 : f32
    %236 = vector.broadcast %cst_111 : f32 to vector<4x64xf32>
    %237 = arith.mulf %236, %235 : vector<4x64xf32>
    %cst_112 = arith.constant 0.707106769 : f32
    %238 = vector.broadcast %cst_112 : f32 to vector<4x64xf32>
    %239 = arith.mulf %235, %238 : vector<4x64xf32>
    %cst_113 = arith.constant 0.000000e+00 : f32
    %240 = vector.broadcast %cst_113 : f32 to vector<4x64xf32>
    %241 = arith.cmpf oge, %239, %240 : vector<4x64xf32>
    %cst_114 = arith.constant 1.000000e+00 : f32
    %cst_115 = arith.constant -1.000000e+00 : f32
    %242 = vector.broadcast %cst_114 : f32 to vector<4x64xf32>
    %243 = vector.broadcast %cst_115 : f32 to vector<4x64xf32>
    %244 = arith.select %241, %242, %243 : vector<4x64xi1>, vector<4x64xf32>
    %245 = math.absf %239 : vector<4x64xf32>
    %cst_116 = arith.constant 0.327591091 : f32
    %246 = vector.broadcast %cst_116 : f32 to vector<4x64xf32>
    %247 = arith.mulf %246, %245 : vector<4x64xf32>
    %cst_117 = arith.constant 1.000000e+00 : f32
    %248 = vector.broadcast %cst_117 : f32 to vector<4x64xf32>
    %249 = arith.addf %248, %247 : vector<4x64xf32>
    %250 = tpu.reciprocal %249 {approx = true} : vector<4x64xf32> -> vector<4x64xf32>
    %cst_118 = arith.constant 1.06140542 : f32
    %251 = vector.broadcast %cst_118 : f32 to vector<4x64xf32>
    %252 = arith.mulf %251, %250 : vector<4x64xf32>
    %cst_119 = arith.constant -1.45315206 : f32
    %253 = vector.broadcast %cst_119 : f32 to vector<4x64xf32>
    %254 = arith.addf %252, %253 : vector<4x64xf32>
    %255 = arith.mulf %254, %250 : vector<4x64xf32>
    %cst_120 = arith.constant 1.42141378 : f32
    %256 = vector.broadcast %cst_120 : f32 to vector<4x64xf32>
    %257 = arith.addf %255, %256 : vector<4x64xf32>
    %258 = arith.mulf %257, %250 : vector<4x64xf32>
    %cst_121 = arith.constant -0.284496725 : f32
    %259 = vector.broadcast %cst_121 : f32 to vector<4x64xf32>
    %260 = arith.addf %258, %259 : vector<4x64xf32>
    %261 = arith.mulf %260, %250 : vector<4x64xf32>
    %cst_122 = arith.constant 0.254829586 : f32
    %262 = vector.broadcast %cst_122 : f32 to vector<4x64xf32>
    %263 = arith.addf %261, %262 : vector<4x64xf32>
    %264 = arith.mulf %263, %250 : vector<4x64xf32>
    %cst_123 = arith.constant 0.000000e+00 : f32
    %265 = vector.broadcast %cst_123 : f32 to vector<4x64xf32>
    %266 = arith.subf %265, %245 : vector<4x64xf32>
    %267 = arith.mulf %266, %245 : vector<4x64xf32>
    %268 = math.exp %267 : vector<4x64xf32>
    %269 = arith.mulf %264, %268 : vector<4x64xf32>
    %cst_124 = arith.constant 1.000000e+00 : f32
    %270 = vector.broadcast %cst_124 : f32 to vector<4x64xf32>
    %271 = arith.subf %270, %269 : vector<4x64xf32>
    %272 = arith.mulf %244, %271 : vector<4x64xf32>
    %cst_125 = arith.constant 1.000000e+00 : f32
    %273 = vector.broadcast %cst_125 : f32 to vector<4x64xf32>
    %274 = arith.addf %273, %272 : vector<4x64xf32>
    %275 = arith.mulf %237, %274 : vector<4x64xf32>
    %c1_126 = arith.constant 1 : index
    %c0_127 = arith.constant 0 : index
    %c0_128 = arith.constant 0 : index
    %276 = vector.load %arg14[%c1_126, %c0_127, %c0_128] : memref<2x64x16xbf16, #tpu.memory_space<vmem>>, vector<1x64x16xbf16>
    %277 = vector.shape_cast %276 : vector<1x64x16xbf16> to vector<64x16xbf16>
    %278 = arith.truncf %275 : vector<4x64xf32> to vector<4x64xbf16>
    %cst_129 = arith.constant dense<0.000000e+00> : vector<4x16xf32>
    %279 = tpu.matmul %278, %277, %cst_129 {dimension_numbers = #tpu.dot_dimension_numbers<[1], [0], [0], [1], [0, 0, 1, 1], [], []>} : vector<4x64xbf16>, vector<64x16xbf16>, vector<4x16xf32> -> vector<4x16xf32>
    %c1_130 = arith.constant 1 : index
    %c0_131 = arith.constant 0 : index
    %c0_132 = arith.constant 0 : index
    %280 = vector.load %arg15[%c1_130, %c0_131, %c0_132] : memref<2x1x16xf32, #tpu.memory_space<vmem>>, vector<1x1x16xf32>
    %281 = vector.shape_cast %280 : vector<1x1x16xf32> to vector<1x16xf32>
    %282 = vector.broadcast %281 : vector<1x16xf32> to vector<4x16xf32>
    %283 = arith.addf %279, %282 : vector<4x16xf32>
    %284 = arith.addf %227, %283 : vector<4x16xf32>
    %c1_133 = arith.constant 1 : index
    %c0_134 = arith.constant 0 : index
    %c0_135 = arith.constant 0 : index
    %285 = vector.load %arg16[%c1_133, %c0_134, %c0_135] : memref<2x1x16xf32, #tpu.memory_space<vmem>>, vector<1x1x16xf32>
    %286 = vector.shape_cast %285 : vector<1x1x16xf32> to vector<1x16xf32>
    %c1_136 = arith.constant 1 : index
    %c0_137 = arith.constant 0 : index
    %c0_138 = arith.constant 0 : index
    %287 = vector.load %arg17[%c1_136, %c0_137, %c0_138] : memref<2x1x16xf32, #tpu.memory_space<vmem>>, vector<1x1x16xf32>
    %288 = vector.shape_cast %287 : vector<1x1x16xf32> to vector<1x16xf32>
    %cst_139 = arith.constant dense<0.000000e+00> : vector<4xf32>
    %289 = vector.multi_reduction <add>, %284, %cst_139 [1] : vector<4x16xf32> to vector<4xf32>
    %290 = vector.shape_cast %289 : vector<4xf32> to vector<4x1xf32>
    %cst_140 = arith.constant 1.600000e+01 : f32
    %291 = vector.broadcast %cst_140 : f32 to vector<4x1xf32>
    %292 = arith.divf %290, %291 : vector<4x1xf32>
    %293 = vector.broadcast %292 : vector<4x1xf32> to vector<4x16xf32>
    %294 = arith.subf %284, %293 : vector<4x16xf32>
    %295 = arith.mulf %294, %294 : vector<4x16xf32>
    %cst_141 = arith.constant dense<0.000000e+00> : vector<4xf32>
    %296 = vector.multi_reduction <add>, %295, %cst_141 [1] : vector<4x16xf32> to vector<4xf32>
    %297 = vector.shape_cast %296 : vector<4xf32> to vector<4x1xf32>
    %cst_142 = arith.constant 1.600000e+01 : f32
    %298 = vector.broadcast %cst_142 : f32 to vector<4x1xf32>
    %299 = arith.divf %297, %298 : vector<4x1xf32>
    %cst_143 = arith.constant 9.99999974E-6 : f32
    %300 = vector.broadcast %cst_143 : f32 to vector<4x1xf32>
    %301 = arith.addf %299, %300 : vector<4x1xf32>
    %302 = math.rsqrt %301 : vector<4x1xf32>
    %303 = vector.broadcast %302 : vector<4x1xf32> to vector<4x16xf32>
    %304 = arith.mulf %294, %303 : vector<4x16xf32>
    %305 = vector.broadcast %286 : vector<1x16xf32> to vector<4x16xf32>
    %306 = arith.mulf %304, %305 : vector<4x16xf32>
    %307 = vector.broadcast %288 : vector<1x16xf32> to vector<4x16xf32>
    %308 = arith.addf %306, %307 : vector<4x16xf32>
    %309 = vector.extract_strided_slice %308 {offsets = [0, 0], sizes = [2, 16], strides = [1, 1]} : vector<4x16xf32> to vector<2x16xf32>
    %c0_144 = arith.constant 0 : index
    %c0_145 = arith.constant 0 : index
    %310 = vector.load %arg18[%c0_144, %c0_145] : memref<16x1xbf16, #tpu.memory_space<vmem>>, vector<16x1xbf16>
    %311 = arith.truncf %309 : vector<2x16xf32> to vector<2x16xbf16>
    %cst_146 = arith.constant dense<0.000000e+00> : vector<2x1xf32>
    %312 = tpu.matmul %311, %310, %cst_146 {dimension_numbers = #tpu.dot_dimension_numbers<[1], [0], [0], [1], [0, 0, 1, 1], [], []>} : vector<2x16xbf16>, vector<16x1xbf16>, vector<2x1xf32> -> vector<2x1xf32>
    %313 = vector.extract_strided_slice %308 {offsets = [2, 0], sizes = [2, 16], strides = [1, 1]} : vector<4x16xf32> to vector<2x16xf32>
    %c0_147 = arith.constant 0 : index
    %c0_148 = arith.constant 0 : index
    %314 = vector.load %arg19[%c0_147, %c0_148] : memref<16x1xbf16, #tpu.memory_space<vmem>>, vector<16x1xbf16>
    %315 = arith.truncf %313 : vector<2x16xf32> to vector<2x16xbf16>
    %cst_149 = arith.constant dense<0.000000e+00> : vector<2x1xf32>
    %316 = tpu.matmul %315, %314, %cst_149 {dimension_numbers = #tpu.dot_dimension_numbers<[1], [0], [0], [1], [0, 0, 1, 1], [], []>} : vector<2x16xbf16>, vector<16x1xbf16>, vector<2x1xf32> -> vector<2x1xf32>
    %317 = arith.addf %312, %316 : vector<2x1xf32>
    %c0_150 = arith.constant 0 : index
    %c0_151 = arith.constant 0 : index
    %318 = vector.load %arg20[%c0_150, %c0_151] : memref<1x1xf32, #tpu.memory_space<vmem>>, vector<1x1xf32>
    %319 = vector.broadcast %318 : vector<1x1xf32> to vector<2x1xf32>
    %320 = arith.addf %317, %319 : vector<2x1xf32>
    %c0_152 = arith.constant 0 : index
    %c0_153 = arith.constant 0 : index
    %321 = vector.load %arg21[%c0_152, %c0_153] : memref<2x1xf32, #tpu.memory_space<vmem>>, vector<2x1xf32>
    tpu.vector_store %arg21[%c0_152, %c0_153], %320 {strides = array<i32>} : memref<2x1xf32, #tpu.memory_space<vmem>>, vector<2x1xf32>,
    return
  }
  func.func @transform_0(%arg0: i32) -> (i32, i32) {
    %c0_i32 = arith.constant 0 : i32
    %c0_i32_0 = arith.constant 0 : i32
    return %arg0, %c0_i32 : i32, i32
  }
  func.func @transform_1(%arg0: i32) -> (i32, i32) {
    %c0_i32 = arith.constant 0 : i32
    %c0_i32_0 = arith.constant 0 : i32
    return %arg0, %c0_i32 : i32, i32
  }
  func.func @transform_2(%arg0: i32) -> (i32, i32) {
    %c0_i32 = arith.constant 0 : i32
    %c0_i32_0 = arith.constant 0 : i32
    %c0_i32_1 = arith.constant 0 : i32
    return %c0_i32, %c0_i32_0 : i32, i32
  }
  func.func @transform_3(%arg0: i32) -> (i32, i32) {
    %c0_i32 = arith.constant 0 : i32
    %c0_i32_0 = arith.constant 0 : i32
    %c0_i32_1 = arith.constant 0 : i32
    return %c0_i32, %c0_i32_0 : i32, i32
  }
  func.func @transform_4(%arg0: i32) -> (i32, i32) {
    %c0_i32 = arith.constant 0 : i32
    %c0_i32_0 = arith.constant 0 : i32
    %c0_i32_1 = arith.constant 0 : i32
    return %c0_i32, %c0_i32_0 : i32, i32
  }
  func.func @transform_5(%arg0: i32) -> (i32, i32, i32) {
    %c0_i32 = arith.constant 0 : i32
    %c0_i32_0 = arith.constant 0 : i32
    %c0_i32_1 = arith.constant 0 : i32
    %c0_i32_2 = arith.constant 0 : i32
    return %c0_i32, %c0_i32_0, %c0_i32_1 : i32, i32, i32
  }
  func.func @transform_6(%arg0: i32) -> (i32, i32, i32) {
    %c0_i32 = arith.constant 0 : i32
    %c0_i32_0 = arith.constant 0 : i32
    %c0_i32_1 = arith.constant 0 : i32
    %c0_i32_2 = arith.constant 0 : i32
    return %c0_i32, %c0_i32_0, %c0_i32_1 : i32, i32, i32
  }
  func.func @transform_7(%arg0: i32) -> (i32, i32, i32) {
    %c0_i32 = arith.constant 0 : i32
    %c0_i32_0 = arith.constant 0 : i32
    %c0_i32_1 = arith.constant 0 : i32
    %c0_i32_2 = arith.constant 0 : i32
    return %c0_i32, %c0_i32_0, %c0_i32_1 : i32, i32, i32
  }
  func.func @transform_8(%arg0: i32) -> (i32, i32, i32) {
    %c0_i32 = arith.constant 0 : i32
    %c0_i32_0 = arith.constant 0 : i32
    %c0_i32_1 = arith.constant 0 : i32
    %c0_i32_2 = arith.constant 0 : i32
    return %c0_i32, %c0_i32_0, %c0_i32_1 : i32, i32, i32
  }
  func.func @transform_9(%arg0: i32) -> (i32, i32, i32) {
    %c0_i32 = arith.constant 0 : i32
    %c0_i32_0 = arith.constant 0 : i32
    %c0_i32_1 = arith.constant 0 : i32
    %c0_i32_2 = arith.constant 0 : i32
    return %c0_i32, %c0_i32_0, %c0_i32_1 : i32, i32, i32
  }
  func.func @transform_10(%arg0: i32) -> (i32, i32, i32) {
    %c0_i32 = arith.constant 0 : i32
    %c0_i32_0 = arith.constant 0 : i32
    %c0_i32_1 = arith.constant 0 : i32
    %c0_i32_2 = arith.constant 0 : i32
    return %c0_i32, %c0_i32_0, %c0_i32_1 : i32, i32, i32
  }
  func.func @transform_11(%arg0: i32) -> (i32, i32, i32) {
    %c0_i32 = arith.constant 0 : i32
    %c0_i32_0 = arith.constant 0 : i32
    %c0_i32_1 = arith.constant 0 : i32
    %c0_i32_2 = arith.constant 0 : i32
    return %c0_i32, %c0_i32_0, %c0_i32_1 : i32, i32, i32
  }
  func.func @transform_12(%arg0: i32) -> (i32, i32, i32) {
    %c0_i32 = arith.constant 0 : i32
    %c0_i32_0 = arith.constant 0 : i32
    %c0_i32_1 = arith.constant 0 : i32
    %c0_i32_2 = arith.constant 0 : i32
    return %c0_i32, %c0_i32_0, %c0_i32_1 : i32, i32, i32
  }
  func.func @transform_13(%arg0: i32) -> (i32, i32, i32) {
    %c0_i32 = arith.constant 0 : i32
    %c0_i32_0 = arith.constant 0 : i32
    %c0_i32_1 = arith.constant 0 : i32
    %c0_i32_2 = arith.constant 0 : i32
    return %c0_i32, %c0_i32_0, %c0_i32_1 : i32, i32, i32
  }
  func.func @transform_14(%arg0: i32) -> (i32, i32, i32) {
    %c0_i32 = arith.constant 0 : i32
    %c0_i32_0 = arith.constant 0 : i32
    %c0_i32_1 = arith.constant 0 : i32
    %c0_i32_2 = arith.constant 0 : i32
    return %c0_i32, %c0_i32_0, %c0_i32_1 : i32, i32, i32
  }
  func.func @transform_15(%arg0: i32) -> (i32, i32, i32) {
    %c0_i32 = arith.constant 0 : i32
    %c0_i32_0 = arith.constant 0 : i32
    %c0_i32_1 = arith.constant 0 : i32
    %c0_i32_2 = arith.constant 0 : i32
    return %c0_i32, %c0_i32_0, %c0_i32_1 : i32, i32, i32
  }
  func.func @transform_16(%arg0: i32) -> (i32, i32, i32) {
    %c0_i32 = arith.constant 0 : i32
    %c0_i32_0 = arith.constant 0 : i32
    %c0_i32_1 = arith.constant 0 : i32
    %c0_i32_2 = arith.constant 0 : i32
    return %c0_i32, %c0_i32_0, %c0_i32_1 : i32, i32, i32
  }
  func.func @transform_17(%arg0: i32) -> (i32, i32) {
    %c0_i32 = arith.constant 0 : i32
    %c0_i32_0 = arith.constant 0 : i32
    %c0_i32_1 = arith.constant 0 : i32
    return %c0_i32, %c0_i32_0 : i32, i32
  }
  func.func @transform_18(%arg0: i32) -> (i32, i32) {
    %c0_i32 = arith.constant 0 : i32
    %c0_i32_0 = arith.constant 0 : i32
    %c0_i32_1 = arith.constant 0 : i32
    return %c0_i32, %c0_i32_0 : i32, i32
  }
  func.func @transform_19(%arg0: i32) -> (i32, i32) {
    %c0_i32 = arith.constant 0 : i32
    %c0_i32_0 = arith.constant 0 : i32
    %c0_i32_1 = arith.constant 0 : i32
    return %c0_i32, %c0_i32_0 : i32, i32
  }
  func.func @transform_20(%arg0: i32) -> (i32, i32) {
    %c0_i32 = arith.constant 0 : i32
    %c0_i32_0 = arith.constant 0 : i32
    return %arg0, %c0_i32 : i32, i32
  }
}

</mosaic_0001>

<bundles_post_ra>
// kernel: tpu_custom_call.1
= control target key start
LH: loop header
LB: loop body
LE: loop exit
PB: predicated region body
PF: predicated region fallthrough
CT: control target
= control target key end

     0   :  { %v77_v0 = vlaneseq  ;;  %v1509_v1 = vmov 0.0   ;;  %vm1510_vm0 = vmmov 0   ;;  %v1511_v3 = vmov 1966171168   ;;  %s1847_s3 = inlined_call_operand.vmem [shape: bf16[32,16], index: 3, kind: input, shape index: {}]   ;;  %s1848_s1 = inlined_call_operand.vmem [shape: bf16[2,32], index: 1, kind: input, shape index: {}]   ;;  %s1849_s0 = inlined_call_operand.vmem [shape: bf16[2,32], index: 0, kind: input, shape index: {}]   ;;  %s1850_s5 = inlined_call_operand.vmem [shape: bf16[2,16,48], index: 5, kind: input, shape index: {}]   ;;  %s1851_s4 = inlined_call_operand.vmem [shape: f32[1,16], index: 4, kind: input, shape index: {}]   ;;  %s1852_s2 = inlined_call_operand.vmem [shape: bf16[16,16], index: 2, kind: input, shape index: {}]   ;;  %s1853_s6 = inlined_call_operand.vmem [shape: f32[2,1,48], index: 6, kind: input, shape index: {}]   ;;  %s1854_s7 = inlined_call_operand.vmem [shape: bf16[2,16,16], index: 7, kind: input, shape index: {}]   ;;  %s1855_s8 = inlined_call_operand.vmem [shape: f32[2,1,16], index: 8, kind: input, shape index: {}]   ;;  %s1856_s11 = inlined_call_operand.vmem [shape: bf16[2,16,64], index: 11, kind: input, shape index: {}]   ;;  %s1857_s9 = inlined_call_operand.vmem [shape: f32[2,1,16], index: 9, kind: input, shape index: {}]   ;;  %s1858_s10 = inlined_call_operand.vmem [shape: f32[2,1,16], index: 10, kind: input, shape index: {}]   ;;  %s1859_s13 = inlined_call_operand.vmem [shape: bf16[2,64,16], index: 13, kind: input, shape index: {}]   ;;  %s1860_s12 = inlined_call_operand.vmem [shape: f32[2,1,64], index: 12, kind: input, shape index: {}]   ;;  %s1861_s14 = inlined_call_operand.vmem [shape: f32[2,1,16], index: 14, kind: input, shape index: {}]   ;;  %s1862_s15 = inlined_call_operand.vmem [shape: f32[2,1,16], index: 15, kind: input, shape index: {}]   ;;  %s1863_s16 = inlined_call_operand.vmem [shape: f32[2,1,16], index: 16, kind: input, shape index: {}]   ;;  %s1864_s18 = inlined_call_operand.vmem [shape: bf16[16,1], index: 18, kind: input, shape index: {}]   ;;  %s1865_s17 = inlined_call_operand.vmem [shape: bf16[16,1], index: 17, kind: input, shape index: {}]   ;;  %s1866_s19 = inlined_call_operand.<no memory space> [shape: f32[1,1], index: 19, kind: input, shape index: {}]   ;;  %s1867_s20 = inlined_call_operand.vmem [shape: f32[2,1], index: 20, kind: output, shape index: {}]  }
   0x1   :  { %1870 = sst [smem:[#allocation3_spill]] %s1847_s3  ;;  %1351 = vmatprep.subr.bf16.mxu0 %v1509_v1  ;;  %1355 = vmatprep.mubr.msk.bf16.mxu0 %vm1510_vm0, %v1509_v1  ;;  %v75_v4 = vunpack.c.l.s4 %v1511_v3  ;;  %vm88_vm1 = vcmask 1040384   ;;  %vm115_vm2 = vcmask 261120   ;;  %vm174_vm3 = vcmask 130048   ;;  %v1659_v22 = vld [vmem:[%s1852_s2] sm:$0xff]   ;;  %s1513_s2 = smov 112  }
   0x2   :  { %1871 = sst [smem:[#allocation4_spill]] %s1848_s1  ;;  %v78_v5 = vshrl.u32 %v77_v0, 7  ;;  %1359 = vmatprep.subr.bf16.mxu1 %v1509_v1  ;;  %1361 = vmatprep.mubr.msk.bf16.mxu1 %vm1510_vm0, %v1509_v1  ;;  %v1244_v23 = vld [vmem:[%s1853_s6] ss:$0 sm:$0xff]  ;;  %vm224_vm4 = vcmask 1041408   ;;  %vm411_vm5 = vcmask 125952  }
   0x3   :  { %1872 = sst [smem:[#allocation5_spill]] %s1849_s0  ;;  %v76_v7 = vunpack.c.0.s8 %v75_v4  ;;  %v1466_v39 = vld [vmem:[%s1854_s7] sm:$0xff]   ;;  %vm565_vm7 = vcmask 523264   ;;  %vm1234_vm9 = vcmask 1024  }
   0x4   :  { %1873 = sst [smem:[#allocation6_spill]] %s1850_s5  ;;  %s1512_s5 = smov 96  }
   0x5   :  { %1874 = sst [smem:[#allocation7_spill]] %s1851_s4  ;;  %v79_v9 = vsub.s32 %v76_v7, %v78_v5 }
   0x6   :  { %s1875_s23 = sld [smem:[#allocation3_spill]] }
   0x7   :  { %s1876_s26 = sld [smem:[#allocation4_spill]] }
   0x8   :  { %s1877_s4 = sld [smem:[#allocation5_spill]] }
   0x9   :  { %s1878_s3 = sld [smem:[#allocation6_spill]] }
   0xa   :  { %s1879_s22 = sld [smem:[#allocation7_spill]] }
   0xc   :  { %v1461_v2 = vld [vmem:[%s1875_s23 + $0x8] sm:$0xff]   ;;  %v1462_v6 = vld [vmem:[%s1875_s23] sm:$0xff]  }
   0xd   :  { %1352 = vmatpush3.bf16.msra.mxu0 %v1461_v2  ;;  %v1463_v8 = vld [vmem:[%s1876_s26] ss:$0 sps:$4 sm:$0x11]  }
   0xe   :  { %1353 = vmatprep.subr.bf16.mxu0 %v1509_v1  ;;  %v80_v10 = vrot.slane %v1463_v8, %v79_v9  ;;  %v70_v11 = vld [vmem:[%s1877_s4] sm:$0x1] }
   0xf   :  { %v1464_v14 = vld [vmem:[%s1878_s3] sm:$0xff]  }
  0x10   :  { %v87_v12 = vrot.slane %v80_v10, %v79_v9  ;;  %1360 = vmatpush3.bf16.msra.mxu1 %v1464_v14  ;;  %v1240_v15 = vld [vmem:[%s1879_s22] ss:$0 sm:$0xff] }
  0x11   :  { %1354 = vmatpush3.bf16.msra.mxu0 %v1462_v6  ;;  %1365 = vmatprep.subr.bf16.mxu1 %v1509_v1  ;;  %v1250_v2 = vld [vmem:[%s1855_s8] ss:$0 sm:$0xff] }
  0x12   :  { %1371 = vmatprep.subr.bf16.mxu0 %v1509_v1  ;;  %v91_v13 = vsel %vm88_vm1, %v70_v11, %v87_v12 }
  0x14   :  { %1356 = vmatmul.mubr.msk.bf16.vlgmr.msra.gmra.mxu0 %vm115_vm2, %v91_v13 }
  0x15   :  { %1373 = vmatprep.mubr.msk.bf16.mxu0 %vm1510_vm0, %v1509_v1  ;;  %1372 = vmatpush3.bf16.msra.mxu0 %v1659_v22 }
  0x16   :  { %1383 = vmatprep.subr.bf16.mxu0 %v1509_v1 }
  0xd4   :  { %v152_v16 = vpop.f32.mrf.mxu0 }
  0xd5   :  { %v1649_v17 = vadd.f32 %v1240_v15, %v152_v16  ;;  %v1467_v15 = vld [vmem:[%s1856_s11] sm:$0xff]  }
  0xd6   :  { %v1357_v18 = vpop.f32.mrf.mxu0 }
  0xd7   :  { %v160_v19 = vpack.c.bf16 %v1649_v17, %v1649_v17 }
  0xd8   :  { %v155_v20 = vpop.f32.mrf.mxu0 }
  0xd9   :  { %1362 = vmatmul.mubr.msk.bf16.vlgmr.msra.gmra.mxu1 %vm174_vm3, %v160_v19  ;;  %v1253_v20 = vld [vmem:[%s1857_s9] ss:$0 sm:$0xff] }
  0xda   :  { %v1358_v21 = vpop.f32.mrf.mxu0  ;;  %1367 = vmatprep.mubr.msk.bf16.mxu1 %vm1510_vm0, %v1509_v1  ;;  %1366 = vmatpush3.bf16.msra.mxu1 %v1659_v22 }
  0xdb   :  { %1377 = vmatprep.subr.bf16.mxu1 %v1509_v1 }
 0x199   :  { %v212_v24 = vpop.f32.mrf.mxu1 }
 0x19a   :  { %v213_v25 = vadd.f32 %v1244_v23, %v212_v24  ;;  %v1254_v23 = vld [vmem:[%s1858_s10] ss:$0 sm:$0xff] }
 0x19b   :  { %v1363_v26 = vpop.f32.mrf.mxu1 }
 0x19c   :  { %339 = vrot.lane.b32.xlu1 %v213_v25, %s1512_s5  ;;  %226 = vrot.lane.b32.xlu0 %v213_v25, %s1513_s2  ;;  %v220_v27 = vrot.slane %v213_v25, 2  ;;  %v222_v28 = vrot.slane %v213_v25, 6  ;;  %v218_v32 = vmul.f32 0.70710677, %v213_v25 }
 0x19d   :  { %v215_v29 = vpop.f32.mrf.mxu1 }
 0x19e   :  { %v225_v30 = vsel %vm224_vm4, %v220_v27, %v222_v28  ;;  %v1468_v27 = vld [vmem:[%s1859_s13 + $0x18] sm:$0xff]   ;;  %v1469_v28 = vld [vmem:[%s1859_s13 + $0x10] sm:$0xff]   ;;  %v1470_v29 = vld [vmem:[%s1859_s13 + $0x8] sm:$0xff]  }
 0x19f   :  { %v1364_v31 = vpop.f32.mrf.mxu1 }
 0x1a0   :  { %344 = vrot.lane.b32.xlu1 %v225_v30, %s1512_s5  ;;  %281 = vrot.lane.b32.xlu0 %v225_v30, %s1513_s2  ;;  %v1471_v30 = vld [vmem:[%s1859_s13] sm:$0xff]  }
 0x1a1   :  { %v1255_v31 = vld [vmem:[%s1860_s12] ss:$0 sm:$0xff] }
 0x20e   :  { %v227_v33 = vpop.permute.xlu0 %226  ;;  %v340_v56 = vpop.permute.xlu1 %339 }
 0x20f   :  { %v229_v34 = vmul.f32 %v227_v33, %v218_v32 }
 0x211   :  { %v230_v35 = vpack.c.bf16 %v229_v34, %v229_v34 }
 0x212   :  { %v282_v36 = vpop.permute.xlu0 %281  ;;  %v345_v60 = vpop.permute.xlu1 %344 }
 0x213   :  { %v284_v37 = vmul.f32 %v282_v36, %v218_v32  ;;  %1368 = vmatmul.mubr.msk.bf16.vlgmr.msra.gmra.mxu1 %vm174_vm3, %v230_v35 }
 0x214   :  { %1379 = vmatprep.mubr.msk.bf16.mxu1 %vm1510_vm0, %v1509_v1  ;;  %1378 = vmatpush3.bf16.msra.mxu1 %v1466_v39 }
 0x215   :  { %v285_v38 = vpack.c.bf16 %v284_v37, %v284_v37  ;;  %1389 = vmatprep.subr.bf16.mxu1 %v1509_v1 }
 0x217   :  { %1374 = vmatmul.mubr.msk.bf16.vlgmr.msra.gmra.mxu0 %vm174_vm3, %v285_v38 }
 0x218   :  { %1385 = vmatprep.mubr.msk.bf16.mxu0 %vm1510_vm0, %v1509_v1  ;;  %1384 = vmatpush3.bf16.msra.mxu0 %v1467_v15 }
 0x219   :  { %1401 = vmatprep.subr.bf16.mxu0 %v1509_v1 }
 0x2d3   :  { %v274_v40 = vpop.f32.mrf.mxu1 }
 0x2d5   :  { %v1369_v41 = vpop.f32.mrf.mxu1 }
 0x2d7   :  { %v277_v42 = vpop.f32.mrf.mxu1  ;;  %v323_v43 = vpop.f32.mrf.mxu0 }
 0x2d8   :  { %v329_v44 = vmax.f32 %v274_v40, %v323_v43 }
 0x2d9   :  { %v1370_v45 = vpop.f32.mrf.mxu1  ;;  %v1375_v46 = vpop.f32.mrf.mxu0 }
 0x2da   :  { %v330_v47 = vsub.f32 %v274_v40, %v329_v44  ;;  %v333_v48 = vsub.f32 %v323_v43, %v329_v44 }
 0x2db   :  { %v326_v49 = vpop.f32.mrf.mxu0 }
 0x2dc   :  { %v331_v50 = vmul.f32 1.442695, %v330_v47  ;;  %v334_v51 = vmul.f32 1.442695, %v333_v48 }
 0x2dd   :  { %v1376_v52 = vpop.f32.mrf.mxu0 }
 0x2de   :  { %1481 = vpow2.f32 %v331_v50 }
 0x2df   :  { %1483 = vpow2.f32 %v334_v51 }
 0x2eb   :  { %v1482_v53 = vpop.eup %1481 }
 0x2ec   :  { %v1484_v54 = vpop.eup %1483 }
 0x2ed   :  { %v336_v55 = vadd.f32 %v1484_v54, %v1482_v53 }
 0x2ef   :  { %1485 = vrcp.f32 %v336_v55 }
 0x2fc   :  { %v1486_v57 = vpop.eup %1485 }
 0x2fd   :  { %v338_v58 = vmul.f32 %v1486_v57, %v1482_v53  ;;  %v343_v59 = vmul.f32 %v1486_v57, %v1484_v54  ;;  %v1514_v57 = vmov -1.0  }
 0x2ff   :  { %v342_v61 = vmul.f32 %v340_v56, %v338_v58  ;;  %v347_v62 = vmul.f32 %v345_v60, %v343_v59 }
 0x301   :  { %v348_v63 = vadd.f32 %v347_v62, %v342_v61 }
 0x303   :  { %v351_v0 = vpack.c.bf16 %v348_v63, %v348_v63 }
 0x305   :  { %1380 = vmatmul.mubr.msk.bf16.vlgmr.msra.gmra.mxu1 %vm174_vm3, %v351_v0  ;;  %v1258_v0 = vld [vmem:[%s1861_s14] ss:$0 sm:$0xff] }
 0x306   :  { %1397 = vmatprep.mubr.msk.bf16.mxu1 %vm1510_vm0, %v1509_v1  ;;  %1390 = vmatpush3.bf16.msra.mxu1 %v1468_v27 }
 0x307   :  { %1391 = vmatprep.subr.bf16.mxu1 %v1509_v1 }
 0x30a   :  { %1392 = vmatpush3.bf16.msra.mxu1 %v1469_v28 }
 0x30b   :  { %1393 = vmatprep.subr.bf16.mxu1 %v1509_v1 }
 0x30e   :  { %1394 = vmatpush3.bf16.msra.mxu1 %v1470_v29 }
 0x30f   :  { %1395 = vmatprep.subr.bf16.mxu1 %v1509_v1 }
 0x312   :  { %1396 = vmatpush3.bf16.msra.mxu1 %v1471_v30 }
 0x313   :  { %1413 = vmatprep.subr.bf16.mxu1 %v1509_v1 }
 0x3c5   :  { %v402_v3 = vpop.f32.mrf.mxu1 }
 0x3c6   :  { %v403_v4 = vadd.f32 %v1250_v2, %v402_v3 }
 0x3c7   :  { %v1381_v5 = vpop.f32.mrf.mxu1 }
 0x3c8   :  { %v408_v6 = vadd.f32 %v403_v4, %v1649_v17 }
 0x3c9   :  { %v405_v7 = vpop.f32.mrf.mxu1 }
 0x3ca   :  { %v412_v8 = vsel %vm411_vm5, %v408_v6, 0.0 }
 0x3cb   :  { %413 = vadd.xlane.f32.xlu0 %v412_v8  ;;  %v1382_v9 = vpop.f32.mrf.mxu1 }
 0x454   :  { %v414_v10 = vpop.xlane.xlu0 %413 }
 0x455   :  { %v416_v11 = vmul.f32 0.0625, %v414_v10 }
 0x457   :  { %v417_v12 = vsub.f32 %v408_v6, %v416_v11 }
 0x459   :  { %v418_v13 = vmul.f32 %v417_v12, %v417_v12 }
 0x45b   :  { %v419_v14 = vsel %vm411_vm5, %v418_v13, 0.0 }
 0x45c   :  { %420 = vadd.xlane.f32.xlu1 %v419_v14  ;;  %v1472_v14 = vld [vmem:[%s1878_s3 + $0x8] sm:$0xff]  }
 0x4e5   :  { %v421_v16 = vpop.xlane.xlu1 %420 }
 0x4e6   :  { %v422_v17 = vmul.f32 0.0625, %v421_v16 }
 0x4e8   :  { %v423_v18 = vadd.f32 1e-05, %v422_v17 }
 0x4ea   :  { %1487 = vrsqrt.f32 %v423_v18 }
 0x4f7   :  { %v1488_v19 = vpop.eup %1487 }
 0x4f8   :  { %v425_v21 = vmul.f32 %v1488_v19, %v417_v12  ;;  %v1264_v19 = vld [vmem:[%s1862_s15] ss:$0 sm:$0xff] }
 0x4fa   :  { %v432_v24 = vmul.f32 %v1253_v20, %v425_v21  ;;  %v1265_v21 = vld [vmem:[%s1863_s16] ss:$0 sm:$0xff] }
 0x4fc   :  { %v1702_v25 = vadd.f32 %v1254_v23, %v432_v24 }
 0x4fe   :  { %v442_v26 = vpack.c.bf16 %v1702_v25, %v1702_v25 }
 0x500   :  { %1386 = vmatmul.mubr.msk.bf16.vlgmr.msra.gmra.mxu0 %vm174_vm3, %v442_v26  ;;  %v1269_v26 = vld [vmem:[%s1853_s6 + $0x1] ss:$0 sm:$0xff] }
 0x501   :  { %1403 = vmatprep.mubr.msk.bf16.mxu0 %vm1510_vm0, %v1509_v1  ;;  %1402 = vmatpush3.bf16.msra.mxu0 %v1472_v14 }
 0x502   :  { %1407 = vmatprep.subr.bf16.mxu0 %v1509_v1 }
 0x5c0   :  { %v493_v32 = vpop.f32.mrf.mxu0 }
 0x5c1   :  { %v494_v33 = vadd.f32 %v1255_v31, %v493_v32 }
 0x5c2   :  { %v1387_v34 = vpop.f32.mrf.mxu0 }
 0x5c3   :  { %v500_v35 = vmul.f32 0.70710677, %v494_v33  ;;  %v499_v60 = vmul.f32 0.5, %v494_v33 }
 0x5c4   :  { %v496_v36 = vpop.f32.mrf.mxu0 }
 0x5c5   :  { %v503_v37 = vand.u32 2147483647, %v500_v35  ;;  %vm501_vm6 = vcmp.ge.f32.partialorder %v500_v35, 0.0 }
 0x5c6   :  { %v1388_v38 = vpop.f32.mrf.mxu0  ;;  %v502_v58 = vsel %vm501_vm6, 1.0, %v1514_v57 }
 0x5c7   :  { %v504_v39 = vmul.f32 0.3275911, %v503_v37  ;;  %v516_v41 = vsub.f32 0.0, %v503_v37 }
 0x5c9   :  { %v505_v40 = vadd.f32 1.0, %v504_v39  ;;  %v517_v42 = vmul.f32 %v516_v41, %v503_v37  ;;  %v1473_v41 = vld [vmem:[%s1854_s7 + $0x8] sm:$0xff]  }
 0x5cb   :  { %1489 = vrcp.f32 %v505_v40  ;;  %v518_v45 = vmul.f32 1.442695, %v517_v42 }
 0x5cd   :  { %1491 = vpow2.f32 %v518_v45 }
 0x5d8   :  { %v1490_v43 = vpop.eup %1489 }
 0x5d9   :  { %v507_v44 = vmul.f32 1.0614054, %v1490_v43 }
 0x5da   :  { %v1492_v54 = vpop.eup %1491 }
 0x5db   :  { %v508_v46 = vadd.f32 -1.4531521, %v507_v44 }
 0x5dd   :  { %v509_v47 = vmul.f32 %v1490_v43, %v508_v46 }
 0x5df   :  { %v510_v48 = vadd.f32 1.4214138, %v509_v47 }
 0x5e1   :  { %v511_v49 = vmul.f32 %v1490_v43, %v510_v48 }
 0x5e3   :  { %v512_v50 = vadd.f32 -0.28449672, %v511_v49 }
 0x5e5   :  { %v513_v51 = vmul.f32 %v1490_v43, %v512_v50 }
 0x5e7   :  { %v514_v52 = vadd.f32 0.2548296, %v513_v51 }
 0x5e9   :  { %v515_v53 = vmul.f32 %v1490_v43, %v514_v52 }
 0x5eb   :  { %v520_v55 = vmul.f32 %v1492_v54, %v515_v53 }
 0x5ed   :  { %v521_v56 = vsub.f32 1.0, %v520_v55 }
 0x5ef   :  { %v522_v59 = vmul.f32 %v521_v56, %v502_v58 }
 0x5f1   :  { %v523_v61 = vadd.f32 1.0, %v522_v59 }
 0x5f3   :  { %v524_v62 = vmul.f32 %v523_v61, %v499_v60 }
 0x5f5   :  { %v533_v63 = vpack.c.bf16 %v524_v62, %v524_v62 }
 0x5f7   :  { %1398 = vmatmul.mubr.msk.bf16.vlgmr.msra.gmra.mxu1 %vm565_vm7, %v533_v63 }
 0x5f8   :  { %1414 = vmatpush3.bf16.msra.mxu1 %v1659_v22  ;;  %1415 = vmatprep.mubr.msk.bf16.mxu1 %vm1510_vm0, %v1509_v1 }
 0x5f9   :  { %1425 = vmatprep.subr.bf16.mxu1 %v1509_v1 }
 0x6b7   :  { %v603_v2 = vpop.f32.mrf.mxu1 }
 0x6b8   :  { %v604_v3 = vadd.f32 %v1258_v0, %v603_v2 }
 0x6b9   :  { %v1399_v4 = vpop.f32.mrf.mxu1 }
 0x6ba   :  { %v609_v5 = vadd.f32 %v604_v3, %v1702_v25 }
 0x6bb   :  { %v606_v6 = vpop.f32.mrf.mxu1 }
 0x6bc   :  { %v612_v7 = vsel %vm411_vm5, %v609_v5, 0.0 }
 0x6bd   :  { %613 = vadd.xlane.f32.xlu0 %v612_v7  ;;  %v1400_v8 = vpop.f32.mrf.mxu1 }
 0x746   :  { %v614_v9 = vpop.xlane.xlu0 %613 }
 0x747   :  { %v615_v10 = vmul.f32 0.0625, %v614_v9 }
 0x749   :  { %v616_v11 = vsub.f32 %v609_v5, %v615_v10  ;;  %v1277_v5 = vld [vmem:[%s1855_s8 + $0x1] ss:$0 sm:$0xff] }
 0x74b   :  { %v617_v12 = vmul.f32 %v616_v11, %v616_v11 }
 0x74d   :  { %v618_v13 = vsel %vm411_vm5, %v617_v12, 0.0 }
 0x74e   :  { %619 = vadd.xlane.f32.xlu0 %v618_v13 }
 0x7d7   :  { %v620_v15 = vpop.xlane.xlu0 %619 }
 0x7d8   :  { %v621_v16 = vmul.f32 0.0625, %v620_v15 }
 0x7da   :  { %v622_v17 = vadd.f32 1e-05, %v621_v16 }
 0x7dc   :  { %1493 = vrsqrt.f32 %v622_v17 }
 0x7e9   :  { %v1494_v18 = vpop.eup %1493 }
 0x7ea   :  { %v624_v20 = vmul.f32 %v1494_v18, %v616_v11  ;;  %v1474_v18 = vld [vmem:[%s1856_s11 + $0x8] sm:$0xff]  }
 0x7ec   :  { %v631_v23 = vmul.f32 %v1264_v19, %v624_v20 }
 0x7ee   :  { %v1750_v24 = vadd.f32 %v1265_v21, %v631_v23 }
 0x7f0   :  { %v642_v25 = vpack.c.bf16 %v1750_v24, %v1750_v24 }
 0x7f2   :  { %1404 = vmatmul.mubr.msk.bf16.vlgmr.msra.gmra.mxu0 %vm174_vm3, %v642_v25 }
 0x7f3   :  { %1408 = vmatpush3.bf16.msra.mxu0 %v1659_v22  ;;  %1409 = vmatprep.mubr.msk.bf16.mxu0 %vm1510_vm0, %v1509_v1 }
 0x7f4   :  { %1419 = vmatprep.subr.bf16.mxu0 %v1509_v1 }
 0x8b2   :  { %v694_v27 = vpop.f32.mrf.mxu0 }
 0x8b3   :  { %v695_v28 = vadd.f32 %v1269_v26, %v694_v27  ;;  %v1283_v26 = vld [vmem:[%s1858_s10 + $0x1] ss:$0 sm:$0xff] }
 0x8b4   :  { %v1405_v29 = vpop.f32.mrf.mxu0 }
 0x8b5   :  { %707 = vrot.lane.b32.xlu1 %v695_v28, %s1513_s2  ;;  %v702_v30 = vrot.slane %v695_v28, 2  ;;  %v704_v31 = vrot.slane %v695_v28, 6  ;;  %v700_v34 = vmul.f32 0.70710677, %v695_v28 }
 0x8b6   :  { %v697_v32 = vpop.f32.mrf.mxu0 }
 0x8b7   :  { %v706_v33 = vsel %vm224_vm4, %v702_v30, %v704_v31  ;;  %v1475_v30 = vld [vmem:[%s1859_s13 + $0x38] sm:$0xff]   ;;  %v1476_v31 = vld [vmem:[%s1859_s13 + $0x30] sm:$0xff]   ;;  %v1477_v32 = vld [vmem:[%s1859_s13 + $0x28] sm:$0xff]  }
 0x8b8   :  { %756 = vrot.lane.b32.xlu0 %v706_v33, %s1513_s2  ;;  %v1406_v22 = vpop.f32.mrf.mxu0 }
 0x8b9   :  { %814 = vrot.lane.b32.xlu1 %v695_v28, %s1512_s5  ;;  %v1287_v22 = vld [vmem:[%s1860_s12 + $0x1] ss:$0 sm:$0xff] }
 0x8bd   :  { %819 = vrot.lane.b32.xlu1 %v706_v33, %s1512_s5  ;;  %v1478_v33 = vld [vmem:[%s1859_s13 + $0x20] sm:$0xff]  }
 0x927   :  { %v708_v35 = vpop.permute.xlu1 %707 }
 0x928   :  { %v710_v36 = vmul.f32 %v708_v35, %v700_v34 }
 0x92a   :  { %v711_v37 = vpack.c.bf16 %v710_v36, %v710_v36  ;;  %v757_v38 = vpop.permute.xlu0 %756 }
 0x92b   :  { %v759_v39 = vmul.f32 %v757_v38, %v700_v34  ;;  %v815_v59 = vpop.permute.xlu1 %814 }
 0x92c   :  { %1410 = vmatmul.mubr.msk.bf16.vlgmr.msra.gmra.mxu0 %vm174_vm3, %v711_v37 }
 0x92d   :  { %v760_v40 = vpack.c.bf16 %v759_v39, %v759_v39  ;;  %1421 = vmatprep.mubr.msk.bf16.mxu0 %vm1510_vm0, %v1509_v1  ;;  %1420 = vmatpush3.bf16.msra.mxu0 %v1473_v41 }
 0x92e   :  { %1431 = vmatprep.subr.bf16.mxu0 %v1509_v1 }
 0x92f   :  { %1416 = vmatmul.mubr.msk.bf16.vlgmr.msra.gmra.mxu1 %vm174_vm3, %v760_v40  ;;  %v820_v63 = vpop.permute.xlu1 %819 }
 0x930   :  { %1427 = vmatprep.mubr.msk.bf16.mxu1 %vm1510_vm0, %v1509_v1  ;;  %1426 = vmatpush3.bf16.msra.mxu1 %v1474_v18 }
 0x931   :  { %1443 = vmatprep.subr.bf16.mxu1 %v1509_v1 }
 0x9ec   :  { %v749_v42 = vpop.f32.mrf.mxu0 }
 0x9ee   :  { %v1411_v43 = vpop.f32.mrf.mxu0 }
 0x9ef   :  { %v798_v44 = vpop.f32.mrf.mxu1 }
 0x9f0   :  { %v804_v45 = vmax.f32 %v749_v42, %v798_v44  ;;  %v752_v46 = vpop.f32.mrf.mxu0 }
 0x9f1   :  { %v1417_v47 = vpop.f32.mrf.mxu1 }
 0x9f2   :  { %v805_v48 = vsub.f32 %v749_v42, %v804_v45  ;;  %v808_v49 = vsub.f32 %v798_v44, %v804_v45  ;;  %v1412_v50 = vpop.f32.mrf.mxu0 }
 0x9f3   :  { %v801_v51 = vpop.f32.mrf.mxu1 }
 0x9f4   :  { %v806_v52 = vmul.f32 1.442695, %v805_v48  ;;  %v809_v53 = vmul.f32 1.442695, %v808_v49 }
 0x9f5   :  { %v1418_v54 = vpop.f32.mrf.mxu1 }
 0x9f6   :  { %1495 = vpow2.f32 %v806_v52 }
 0x9f7   :  { %1497 = vpow2.f32 %v809_v53 }
 0xa03   :  { %v1496_v55 = vpop.eup %1495 }
 0xa04   :  { %v1498_v56 = vpop.eup %1497 }
 0xa05   :  { %v811_v58 = vadd.f32 %v1498_v56, %v1496_v55 }
 0xa07   :  { %1499 = vrcp.f32 %v811_v58 }
 0xa14   :  { %v1500_v60 = vpop.eup %1499 }
 0xa15   :  { %v813_v61 = vmul.f32 %v1500_v60, %v1496_v55  ;;  %v818_v62 = vmul.f32 %v1500_v60, %v1498_v56 }
 0xa17   :  { %v817_v0 = vmul.f32 %v815_v59, %v813_v61  ;;  %v822_v2 = vmul.f32 %v820_v63, %v818_v62 }
 0xa19   :  { %v823_v3 = vadd.f32 %v822_v2, %v817_v0 }
 0xa1b   :  { %v827_v4 = vpack.c.bf16 %v823_v3, %v823_v3  ;;  %v1299_v3 = vld [vmem:[%s1861_s14 + $0x1] ss:$0 sm:$0xff] }
 0xa1d   :  { %1422 = vmatmul.mubr.msk.bf16.vlgmr.msra.gmra.mxu0 %vm174_vm3, %v827_v4 }
 0xa1e   :  { %1439 = vmatprep.mubr.msk.bf16.mxu0 %vm1510_vm0, %v1509_v1  ;;  %1432 = vmatpush3.bf16.msra.mxu0 %v1475_v30 }
 0xa1f   :  { %1433 = vmatprep.subr.bf16.mxu0 %v1509_v1 }
 0xa22   :  { %1434 = vmatpush3.bf16.msra.mxu0 %v1476_v31 }
 0xa23   :  { %1435 = vmatprep.subr.bf16.mxu0 %v1509_v1 }
 0xa26   :  { %1436 = vmatpush3.bf16.msra.mxu0 %v1477_v32 }
 0xa27   :  { %1437 = vmatprep.subr.bf16.mxu0 %v1509_v1 }
 0xa2a   :  { %1438 = vmatpush3.bf16.msra.mxu0 %v1478_v33 }
 0xadd   :  { %v879_v6 = vpop.f32.mrf.mxu0 }
 0xade   :  { %v880_v7 = vadd.f32 %v1277_v5, %v879_v6 }
 0xadf   :  { %v1423_v8 = vpop.f32.mrf.mxu0 }
 0xae0   :  { %v885_v9 = vadd.f32 %v880_v7, %v1750_v24  ;;  %v1282_v24 = vld [vmem:[%s1857_s9 + $0x1] ss:$0 sm:$0xff] }
 0xae1   :  { %v882_v10 = vpop.f32.mrf.mxu0 }
 0xae2   :  { %v890_v11 = vsel %vm411_vm5, %v885_v9, 0.0 }
 0xae3   :  { %891 = vadd.xlane.f32.xlu0 %v890_v11  ;;  %v1424_v12 = vpop.f32.mrf.mxu0 }
 0xb6c   :  { %v892_v13 = vpop.xlane.xlu0 %891 }
 0xb6d   :  { %v893_v14 = vmul.f32 0.0625, %v892_v13 }
 0xb6f   :  { %v894_v15 = vsub.f32 %v885_v9, %v893_v14 }
 0xb71   :  { %v895_v16 = vmul.f32 %v894_v15, %v894_v15 }
 0xb73   :  { %v896_v17 = vsel %vm411_vm5, %v895_v16, 0.0 }
 0xb74   :  { %897 = vadd.xlane.f32.xlu1 %v896_v17 }
 0xbfd   :  { %v898_v19 = vpop.xlane.xlu1 %897 }
 0xbfe   :  { %v899_v20 = vmul.f32 0.0625, %v898_v19 }
 0xc00   :  { %v900_v21 = vadd.f32 1e-05, %v899_v20  ;;  %v1307_v20 = vld [vmem:[%s1862_s15 + $0x1] ss:$0 sm:$0xff] }
 0xc02   :  { %1501 = vrsqrt.f32 %v900_v21 }
 0xc0f   :  { %v1502_v23 = vpop.eup %1501 }
 0xc10   :  { %v902_v25 = vmul.f32 %v1502_v23, %v894_v15  ;;  %v1479_v15 = vld [vmem:[%s1864_s18] sm:$0xff]  }
 0xc11   :  { %v1308_v23 = vld [vmem:[%s1863_s16 + $0x1] ss:$0 sm:$0xff] }
 0xc12   :  { %v909_v27 = vmul.f32 %v1282_v24, %v902_v25 }
 0xc14   :  { %v916_v28 = vadd.f32 %v1283_v26, %v909_v27  ;;  %v1480_v27 = vld [vmem:[%s1865_s17] sm:$0xff]  }
 0xc16   :  { %v920_v29 = vpack.c.bf16 %v916_v28, %v916_v28 }
 0xc18   :  { %1428 = vmatmul.mubr.msk.bf16.vlgmr.msra.gmra.mxu1 %vm174_vm3, %v920_v29  ;;  %v25_v29 = vstv %s1866_s19 }
 0xc19   :  { %1445 = vmatprep.mubr.msk.bf16.mxu1 %vm1510_vm0, %v1509_v1  ;;  %1444 = vmatpush3.bf16.msra.mxu1 %v1479_v15  ;;  %26 = vst [vmem:[#allocation2] sm:$0x1] %v25_v29 }
 0xc1a   :  { %1449 = vmatprep.subr.bf16.mxu1 %v1509_v1 }
 0xcd8   :  { %v972_v34 = vpop.f32.mrf.mxu1 }
 0xcd9   :  { %v973_v35 = vadd.f32 %v1287_v22, %v972_v34  ;;  %v1313_v34 = vld [vmem:[#allocation2] ss:$0 sm:$0xff] }
 0xcda   :  { %v1429_v36 = vpop.f32.mrf.mxu1 }
 0xcdb   :  { %v979_v37 = vmul.f32 0.70710677, %v973_v35  ;;  %v978_v62 = vmul.f32 0.5, %v973_v35 }
 0xcdc   :  { %v975_v38 = vpop.f32.mrf.mxu1 }
 0xcdd   :  { %v982_v39 = vand.u32 2147483647, %v979_v37  ;;  %vm980_vm8 = vcmp.ge.f32.partialorder %v979_v37, 0.0 }
 0xcde   :  { %v1430_v40 = vpop.f32.mrf.mxu1  ;;  %v981_v60 = vsel %vm980_vm8, 1.0, %v1514_v57 }
 0xcdf   :  { %v983_v41 = vmul.f32 0.3275911, %v982_v39  ;;  %v995_v43 = vsub.f32 0.0, %v982_v39 }
 0xce1   :  { %v984_v42 = vadd.f32 1.0, %v983_v41  ;;  %v996_v44 = vmul.f32 %v995_v43, %v982_v39 }
 0xce3   :  { %1503 = vrcp.f32 %v984_v42  ;;  %v997_v47 = vmul.f32 1.442695, %v996_v44 }
 0xce5   :  { %1505 = vpow2.f32 %v997_v47 }
 0xcf0   :  { %v1504_v45 = vpop.eup %1503 }
 0xcf1   :  { %v986_v46 = vmul.f32 1.0614054, %v1504_v45 }
 0xcf2   :  { %v1506_v56 = vpop.eup %1505 }
 0xcf3   :  { %v987_v48 = vadd.f32 -1.4531521, %v986_v46 }
 0xcf5   :  { %v988_v49 = vmul.f32 %v1504_v45, %v987_v48 }
 0xcf7   :  { %v989_v50 = vadd.f32 1.4214138, %v988_v49 }
 0xcf9   :  { %v990_v51 = vmul.f32 %v1504_v45, %v989_v50 }
 0xcfb   :  { %v991_v52 = vadd.f32 -0.28449672, %v990_v51 }
 0xcfd   :  { %v992_v53 = vmul.f32 %v1504_v45, %v991_v52 }
 0xcff   :  { %v993_v54 = vadd.f32 0.2548296, %v992_v53 }
 0xd01   :  { %v994_v55 = vmul.f32 %v1504_v45, %v993_v54 }
 0xd03   :  { %v999_v58 = vmul.f32 %v1506_v56, %v994_v55 }
 0xd05   :  { %v1000_v59 = vsub.f32 1.0, %v999_v58 }
 0xd07   :  { %v1001_v61 = vmul.f32 %v1000_v59, %v981_v60 }
 0xd09   :  { %v1002_v63 = vadd.f32 1.0, %v1001_v61 }
 0xd0b   :  { %v1003_v0 = vmul.f32 %v1002_v63, %v978_v62 }
 0xd0d   :  { %v1013_v2 = vpack.c.bf16 %v1003_v0, %v1003_v0 }
 0xd0f   :  { %1440 = vmatmul.mubr.msk.bf16.vlgmr.msra.gmra.mxu0 %vm565_vm7, %v1013_v2 }
 0xdcf   :  { %v1083_v4 = vpop.f32.mrf.mxu0 }
 0xdd0   :  { %v1084_v5 = vadd.f32 %v1299_v3, %v1083_v4 }
 0xdd1   :  { %v1441_v6 = vpop.f32.mrf.mxu0 }
 0xdd2   :  { %v1089_v7 = vadd.f32 %v1084_v5, %v916_v28 }
 0xdd3   :  { %v1086_v8 = vpop.f32.mrf.mxu0 }
 0xdd4   :  { %v1094_v9 = vsel %vm411_vm5, %v1089_v7, 0.0 }
 0xdd5   :  { %1095 = vadd.xlane.f32.xlu0 %v1094_v9  ;;  %v1442_v57 = vpop.f32.mrf.mxu0 }
 0xe5e   :  { %v1096_v10 = vpop.xlane.xlu0 %1095 }
 0xe5f   :  { %v1097_v11 = vmul.f32 0.0625, %v1096_v10 }
 0xe61   :  { %v1098_v12 = vsub.f32 %v1089_v7, %v1097_v11 }
 0xe63   :  { %v1099_v13 = vmul.f32 %v1098_v12, %v1098_v12 }
 0xe65   :  { %v1100_v14 = vsel %vm411_vm5, %v1099_v13, 0.0 }
 0xe66   :  { %1101 = vadd.xlane.f32.xlu0 %v1100_v14 }
 0xeef   :  { %v1102_v16 = vpop.xlane.xlu0 %1101 }
 0xef0   :  { %v1103_v17 = vmul.f32 0.0625, %v1102_v16 }
 0xef2   :  { %v1104_v18 = vadd.f32 1e-05, %v1103_v17 }
 0xef4   :  { %1507 = vrsqrt.f32 %v1104_v18 }
 0xf01   :  { %v1508_v19 = vpop.eup %1507 }
 0xf02   :  { %v1106_v21 = vmul.f32 %v1508_v19, %v1098_v12 }
 0xf04   :  { %v1113_v24 = vmul.f32 %v1307_v20, %v1106_v21 }
 0xf06   :  { %v1120_v25 = vadd.f32 %v1308_v23, %v1113_v24 }
 0xf08   :  { %v1123_v26 = vpack.c.bf16 %v1120_v25, %v1120_v25 }
 0xf0a   :  { %v1127_v28 = vrot.slane %v1123_v26, 1 }
 0xf0c   :  { %1446 = vmatmul.mubr.msk.bf16.vlgmr.msra.gmra.mxu1 %vm174_vm3, %v1127_v28 }
 0xf0d   :  { %1450 = vmatpush3.bf16.msra.mxu1 %v1480_v27  ;;  %1451 = vmatprep.mubr.msk.bf16.mxu1 %vm1510_vm0, %v1509_v1 }
 0xf14   :  { %1452 = vmatmul.mubr.msk.bf16.vlgmr.msra.gmra.mxu1 %vm174_vm3, %v1123_v26 }
 0xfcc   :  { %v1171_v30 = vpop.f32.mrf.mxu1 }
 0xfce   :  { %v1447_v31 = vpop.f32.mrf.mxu1 }
 0xfd0   :  { %v1174_v32 = vpop.f32.mrf.mxu1 }
 0xfd2   :  { %v1448_v33 = vpop.f32.mrf.mxu1 }
 0xfd4   :  { %v1220_v22 = vpop.f32.mrf.mxu1 }
 0xfd5   :  { %v1221_v35 = vadd.f32 %v1220_v22, %v1171_v30 }
 0xfd6   :  { %v1453_v36 = vpop.f32.mrf.mxu1 }
 0xfd7   :  { %v1233_v37 = vadd.f32 %v1313_v34, %v1221_v35 }
 0xfd8   :  { %v1223_v38 = vpop.f32.mrf.mxu1 }
 0xfd9   :  { %1235 = vst.msk [vmem:[%s1867_s20] sm:$0x3] %vm1234_vm9, %v1233_v37 }
 0xfda   :  { %v1454_v1 = vpop.f32.mrf.mxu1 }

</bundles_post_ra>
